<compile_context>
chip_gen: v7x
topology: tpu7x:2x2x1
jax: 0.10.0
libtpu: 0.0.40
codegen_flags: <defaults>
</compile_context>

<pallas_src>
import functools
import math

import jax
import jax.numpy as jnp
from jax import lax
from jax import nn as jnn
from jax.experimental import pallas as pl
from jax.experimental.pallas import tpu as pltpu


def _round_up(x, m):
    return (x + m - 1) // m * m


def _erf(x):
    # Abramowitz & Stegun 7.1.26 rational approximation, |err| < 1.5e-7.
    # TODO(synk): switch to lax.erf / tanh-GELU if VALU ever becomes the
    # binding slot (the exp already goes to the EUP).
    a1, a2, a3, a4, a5 = (0.254829592, -0.284496736, 1.421413741,
                          -1.453152027, 1.061405429)
    p = 0.3275911
    ax = jnp.abs(x)
    t = 1.0 / (1.0 + p * ax)
    poly = ((((a5 * t + a4) * t + a3) * t + a2) * t + a1) * t
    y = 1.0 - poly * jnp.exp(-(ax * ax))
    return jnp.where(x >= 0, y, -y)


def _gelu_exact(x):
    return 0.5 * x * (1.0 + _erf(x * 0.7071067811865476))


def _map_interpreter_kernel(x_ref, d2_ref, db2_ref, w1_ref, vec_ref, o_ref, *, eps):
    # x_ref:   (1, TP, C)     input pixels, channels-last, compute dtype (bf16/fp32)
    # d2_ref:  (1, 4*Qp, C)   stacked D2[d2] = dec @ W2[d2]^T, compute dtype
    # db2_ref: (1, 4*Qp, 1)   dec @ b2 (tiled over the 4 d2 taps), fp32
    # w1_ref:  (4, C, C)      conv1 weight, tap d1 = d1i*2 + d1j, layout (cin, cout)
    # vec_ref: (3, C)         rows: conv1 bias, norm weight, norm bias (fp32)
    # o_ref:   (1, 4, 4*Qp, TP) fp32
    x = x_ref[0]
    d2 = d2_ref[0]
    db2 = db2_ref[0]
    vec = vec_ref[...]
    b1 = vec[0:1, :]
    gamma = vec[1:2, :]
    beta = vec[2:3, :]

    # TODO(synk): switch to pl.loop(0, 4) with dynamic w1_ref[d1] / o_ref[0, d1]
    # if a bundle dump ever shows VMEM spill pressure from the unrolled taps.
    for d1 in range(4):
        # deconv1 tap d1: per-pixel channel matmul on the MXU (bf16 -> fp32 acc)
        h = jnp.dot(x, w1_ref[d1], preferred_element_type=jnp.float32) + b1
        # Norm2d: point-wise mean/var over the channel dim (biased variance), fp32
        u = jnp.mean(h, axis=-1, keepdims=True)
        cen = h - u
        var = jnp.mean(cen * cen, axis=-1, keepdims=True)
        hn = cen * lax.rsqrt(var + eps) * gamma + beta
        hg = _gelu_exact(hn).astype(d2.dtype)
        # reassociated second deconv + bmm: (4*Qp, C) x (TP, C)^T -> (4*Qp, TP)
        o = lax.dot_general(d2, hg, (((1,), (1,)), ((), ())),
                            preferred_element_type=jnp.float32)
        o_ref[0, d1] = (o + db2).astype(o_ref.dtype)


def map_interpreter_forward(inputs, params, *, eps=1e-6,
                            compute_dtype=jnp.bfloat16,
                            max_pixel_tile=512):
    """Fused MapInterpreter forward. compute_dtype=bf16 uses the native MXU path
    with fp32 accumulation; compute_dtype=fp32 reproduces the module exactly.
    max_pixel_tile: 512 is safe on v7x (64 MiB VMEM); v5e/v6e can use 1024."""
    assert max_pixel_tile % 128 == 0
    src = inputs['decoder_src']        # (hw, b, c)
    dec = inputs['decoder_output']     # (q, b, c)
    hw, b, c = src.shape
    q = dec.shape[0]
    h = w = int(math.sqrt(hw))
    assert h * w == hw, "decoder_src spatial dim must be a perfect square"

    # ---- one-time layout glue + per-batch precompute (outside the hot loop) ----
    x_pix = jnp.transpose(src, (1, 0, 2)).astype(compute_dtype)    # (b, hw, c)
    dec_bqc = jnp.transpose(dec, (1, 0, 2)).astype(jnp.float32)    # (b, q, c)
    # ConvTranspose2d weight is (Cin, Cout, kH, kW); pack kernel taps leading.
    w1p = jnp.transpose(params['w1'], (2, 3, 0, 1)).reshape(4, c, c)
    w2p = jnp.transpose(params['w2'], (2, 3, 0, 1)).reshape(4, c, c)
    # Reassociate the 2nd deconv through decoder_output (exact algebra):
    #   dec @ (hg @ W2[d2] + b2)^T == (dec @ W2[d2]^T) @ hg^T + dec @ b2
    d2_all = jnp.einsum('bqo,dko->bdqk', dec_bqc,
                        w2p.astype(jnp.float32))                   # (b, 4, q, c)
    db2 = jnp.einsum('bqo,o->bq', dec_bqc,
                     params['b2'].astype(jnp.float32))             # (b, q)

    q_pad = _round_up(max(q, 1), 8)                                # sublane-dense Q
    if q_pad != q:
        d2_all = jnp.pad(d2_all, ((0, 0), (0, 0), (0, q_pad - q), (0, 0)))
        db2 = jnp.pad(db2, ((0, 0), (0, q_pad - q)))
    qs = 4 * q_pad
    d2_stack = d2_all.reshape(b, qs, c).astype(compute_dtype)      # (b, 4*Qp, c)
    db2_stack = jnp.broadcast_to(db2[:, None, :], (b, 4, q_pad))
    db2_stack = db2_stack.reshape(b, qs, 1).astype(jnp.float32)

    w1p = w1p.astype(compute_dtype)
    vec = jnp.stack([params['b1'], params['norm_weight'],
                     params['norm_bias']], axis=0).astype(jnp.float32)   # (3, c)

    # ---- pixel-row tiling (lane-dense: multiples of 128 once hw > 128) ----
    if hw <= 128:
        hw_pad = _round_up(hw, 8)
        tp = hw_pad                         # single full-extent block
    elif hw <= max_pixel_tile:
        hw_pad = _round_up(hw, 128)
        tp = hw_pad
    else:
        tp = max_pixel_tile                 # multiple of 128
        hw_pad = _round_up(hw, tp)
    if hw_pad != hw:
        x_pix = jnp.pad(x_pix, ((0, 0), (0, hw_pad - hw), (0, 0)))
    n_pt = hw_pad // tp

    in_item = jnp.dtype(compute_dtype).itemsize
    # VMEM budget: double-buffered pipelined blocks + fp32 intermediates.
    vmem_est = (2 * tp * c * in_item                    # pixel tile
                + 2 * 4 * qs * tp * 4                   # output block (fp32)
                + 2 * (qs * c * in_item + qs * 4)       # D2 + db2 (resident)
                + 2 * 4 * c * c * in_item               # conv1 weights (resident)
                + 2 * 3 * c * 4                         # bias / LN affine
                + 4 * tp * c * 4)                       # per-tap fp32 intermediates
    vmem_limit = int(min(96 * 2 ** 20, max(32 * 2 ** 20, 2 * vmem_est)))

    cost = pl.CostEstimate(
        flops=2 * b * hw_pad * 4 * c * (c + qs),
        transcendentals=b * hw_pad * 4 * (c + 1),
        bytes_accessed=(b * hw_pad * c * in_item
                        + b * qs * (c * in_item + 4)
                        + 4 * c * c * in_item + 3 * c * 4
                        + b * 4 * qs * hw_pad * 4),
    )

    kernel = functools.partial(_map_interpreter_kernel, eps=eps)

    # TODO(synk): mark the resident operands (D2/db2/W1/vec) with
    # pipeline_mode=pl.Buffered(1) if the VMEM budget ever gets tight
    # (e.g. tp=1024 on v7x); their index_maps are already grid-constant.
    out_raw = pl.pallas_call(
        kernel,
        out_shape=jax.ShapeDtypeStruct((b, 4, qs, hw_pad), jnp.float32),
        grid_spec=pltpu.PrefetchScalarGridSpec(
            num_scalar_prefetch=0,
            grid=(b, n_pt),
            in_specs=[
                pl.BlockSpec((1, tp, c), lambda bi, pt: (bi, pt, 0)),   # pixel tile
                pl.BlockSpec((1, qs, c), lambda bi, pt: (bi, 0, 0)),    # stacked D2
                pl.BlockSpec((1, qs, 1), lambda bi, pt: (bi, 0, 0)),    # dec @ b2
                pl.BlockSpec((4, c, c), lambda bi, pt: (0, 0, 0)),      # conv1 W
                pl.BlockSpec((3, c), lambda bi, pt: (0, 0)),            # b1/gamma/beta
            ],
            out_specs=pl.BlockSpec((1, 4, qs, tp), lambda bi, pt: (bi, 0, 0, pt)),
        ),
        compiler_params=pltpu.CompilerParams(
            dimension_semantics=("parallel", "parallel"),
            vmem_limit_bytes=vmem_limit,
        ),
        cost_estimate=cost,
    )(x_pix, d2_stack, db2_stack, w1p, vec)

    # ---- interleave the (d1i, d1j, d2i, d2j) sub-pixel planes spatially ----
    # TODO(synk): if the downstream consumer can take the raw (b,4,4,q,hw)
    # layout (and/or bf16), skip this XLA transpose round-trip entirely.
    x_raw = out_raw.reshape(b, 4, 4, q_pad, hw_pad)[:, :, :, :q, :hw]
    x_raw = x_raw.reshape(b, 2, 2, 2, 2, q, h, w)      # (b,d1i,d1j,d2i,d2j,q,i,j)
    x_out = jnp.transpose(x_raw, (0, 5, 6, 1, 3, 7, 2, 4))
    x_out = x_out.reshape(b, q, 4 * h, 4 * w)          # row=4i+2d1i+d2i, col=4j+2d1j+d2j

    out = dict(inputs)
    out['head_output'] = x_out
    return out


# ----------------------------- pure-JAX reference -----------------------------
def _reference_forward(inputs, params, eps=1e-6):
    src = inputs['decoder_src']
    dec = inputs['decoder_output']
    hw, b, c = src.shape
    h = w = int(math.sqrt(hw))
    x = jnp.transpose(src.reshape(h, w, b, c), (2, 3, 0, 1))   # (b, c, h, w)

    def deconv2x2(x_bchw, W, bias):
        xl = jnp.transpose(x_bchw, (0, 2, 3, 1))               # (b, h, w, cin)
        y = jnp.einsum('bijc,coxy->bixjyo', xl, W)             # (b, h, 2, w, 2, cout)
        bb, hh, _, ww, _, co = y.shape
        y = y.reshape(bb, 2 * hh, 2 * ww, co) + bias
        return jnp.transpose(y, (0, 3, 1, 2))                  # (b, cout, 2h, 2w)

    y = deconv2x2(x, params['w1'], params['b1'])
    u = y.mean(axis=1, keepdims=True)
    s = ((y - u) ** 2).mean(axis=1, keepdims=True)
    y = (y - u) / jnp.sqrt(s + eps)
    y = (params['norm_weight'][None, :, None, None] * y
         + params['norm_bias'][None, :, None, None])
    y = jnn.gelu(y, approximate=False)                         # exact erf GELU
    y = deconv2x2(y, params['w2'], params['b2'])
    bb, cc, ho, wo = y.shape
    srcf = y.reshape(bb, cc, ho * wo)
    dec_bqc = jnp.transpose(dec, (1, 0, 2))
    xo = jnp.einsum('bqc,bcs->bqs', dec_bqc, srcf)
    return xo.reshape(bb, dec_bqc.shape[1], ho, wo)


if __name__ == "__main__":
    key = jax.random.PRNGKey(0)
    hidden_dim = 32          # small stand-in for the default 256
    h = w = 4
    hw = h * w
    batch, q = 2, 8

    keys = jax.random.split(key, 8)
    src = jax.random.normal(keys[0], (hw, batch, hidden_dim), jnp.float32)
    dec = jax.random.normal(keys[1], (q, batch, hidden_dim), jnp.float32)

    kbound = 1.0 / math.sqrt(hidden_dim * 2 * 2)
    params = {
        'w1': jax.random.uniform(keys[2], (hidden_dim, hidden_dim, 2, 2),
                                 jnp.float32, -kbound, kbound),
        'b1': jax.random.uniform(keys[3], (hidden_dim,), jnp.float32, -kbound, kbound),
        'w2': jax.random.uniform(keys[4], (hidden_dim, hidden_dim, 2, 2),
                                 jnp.float32, -kbound, kbound),
        'b2': jax.random.uniform(keys[5], (hidden_dim,), jnp.float32, -kbound, kbound),
        'norm_weight': 1.0 + 0.1 * jax.random.normal(keys[6], (hidden_dim,), jnp.float32),
        'norm_bias': 0.1 * jax.random.normal(keys[7], (hidden_dim,), jnp.float32),
    }

    inputs = {'decoder_src': src, 'decoder_output': dec}
    ref = _reference_forward(inputs, params)

    # fp32 path: proves the reassociated algorithm matches the module exactly.
    out_fp32 = map_interpreter_forward(inputs, params, compute_dtype=jnp.float32)
    head_fp32 = jax.block_until_ready(out_fp32['head_output'])
    assert head_fp32.shape == (batch, q, 4 * h, 4 * w), head_fp32.shape
    err32 = float(jnp.max(jnp.abs(head_fp32 - ref)))
    assert jnp.allclose(head_fp32, ref, atol=1e-3, rtol=1e-3), f"fp32 mismatch: {err32}"

    # bf16 path (default fast path): bf16 MXU matmuls with fp32 accumulation.
    out_bf16 = map_interpreter_forward(inputs, params)
    head_bf16 = jax.block_until_ready(out_bf16['head_output'])
    assert head_bf16.shape == (batch, q, 4 * h, 4 * w), head_bf16.shape
    err16 = float(jnp.max(jnp.abs(head_bf16 - ref)))
    assert jnp.allclose(head_bf16, ref, atol=6e-2, rtol=6e-2), f"bf16 mismatch: {err16}"

    print("KERNEL_OK")
</pallas_src>

<mosaic_0001>
module attributes {stable_mosaic.version = 11 : i64} {
  func.func @_map_interpreter_kernel(%arg0: i32, %arg1: i32, %arg2: memref<1x16x32xf32, #tpu.memory_space<vmem>>, %arg3: memref<1x32x32xf32, #tpu.memory_space<vmem>>, %arg4: memref<1x32x1xf32, #tpu.memory_space<vmem>>, %arg5: memref<4x32x32xf32, #tpu.memory_space<vmem>>, %arg6: memref<3x32xf32, #tpu.memory_space<vmem>>, %arg7: memref<1x4x32x16xf32, #tpu.memory_space<vmem>>) attributes {dimension_semantics = [#tpu.dimension_semantics<parallel>, #tpu.dimension_semantics<parallel>], iteration_bounds = array<i64: 2, 1>, scalar_prefetch = 0 : i64, scratch_operands = 0 : i64, tpu.core_type = #tpu.core_type<tc>, window_params = [{transform_indices = @transform_0, window_bounds = array<i64: 1, 16, 32>}, {transform_indices = @transform_1, window_bounds = array<i64: 1, 32, 32>}, {transform_indices = @transform_2, window_bounds = array<i64: 1, 32, 1>}, {pipeline_mode = #tpu.pipeline_mode<synchronous>, transform_indices = @transform_3, window_bounds = array<i64: 4, 32, 32>}, {pipeline_mode = #tpu.pipeline_mode<synchronous>, transform_indices = @transform_4, window_bounds = array<i64: 3, 32>}, {transform_indices = @transform_5, window_bounds = array<i64: 1, 4, 32, 16>}]} {
    %c0 = arith.constant 0 : index
    %c0_0 = arith.constant 0 : index
    %c0_1 = arith.constant 0 : index
    %0 = vector.load %arg2[%c0, %c0_0, %c0_1] : memref<1x16x32xf32, #tpu.memory_space<vmem>>, vector<1x16x32xf32>
    %1 = vector.shape_cast %0 : vector<1x16x32xf32> to vector<16x32xf32>
    %c0_2 = arith.constant 0 : index
    %c0_3 = arith.constant 0 : index
    %c0_4 = arith.constant 0 : index
    %2 = vector.load %arg3[%c0_2, %c0_3, %c0_4] : memref<1x32x32xf32, #tpu.memory_space<vmem>>, vector<1x32x32xf32>
    %3 = vector.shape_cast %2 : vector<1x32x32xf32> to vector<32x32xf32>
    %c0_5 = arith.constant 0 : index
    %c0_6 = arith.constant 0 : index
    %c0_7 = arith.constant 0 : index
    %4 = vector.load %arg4[%c0_5, %c0_6, %c0_7] : memref<1x32x1xf32, #tpu.memory_space<vmem>>, vector<1x32x1xf32>
    %5 = vector.shape_cast %4 : vector<1x32x1xf32> to vector<32x1xf32>
    %c0_8 = arith.constant 0 : index
    %c0_9 = arith.constant 0 : index
    %6 = vector.load %arg6[%c0_8, %c0_9] : memref<3x32xf32, #tpu.memory_space<vmem>>, vector<3x32xf32>
    %7 = vector.extract_strided_slice %6 {offsets = [0, 0], sizes = [1, 32], strides = [1, 1]} : vector<3x32xf32> to vector<1x32xf32>
    %8 = vector.extract_strided_slice %6 {offsets = [1, 0], sizes = [1, 32], strides = [1, 1]} : vector<3x32xf32> to vector<1x32xf32>
    %9 = vector.extract_strided_slice %6 {offsets = [2, 0], sizes = [1, 32], strides = [1, 1]} : vector<3x32xf32> to vector<1x32xf32>
    %c0_10 = arith.constant 0 : index
    %c0_11 = arith.constant 0 : index
    %c0_12 = arith.constant 0 : index
    %10 = vector.load %arg5[%c0_10, %c0_11, %c0_12] : memref<4x32x32xf32, #tpu.memory_space<vmem>>, vector<1x32x32xf32>
    %11 = vector.shape_cast %10 : vector<1x32x32xf32> to vector<32x32xf32>
    %cst = arith.constant dense<0.000000e+00> : vector<16x32xf32>
    %12 = tpu.matmul %1, %11, %cst {dimension_numbers = #tpu.dot_dimension_numbers<[1], [0], [0], [1], [0, 0, 1, 1], [], []>} : vector<16x32xf32>, vector<32x32xf32>, vector<16x32xf32> -> vector<16x32xf32>
    %13 = vector.broadcast %7 : vector<1x32xf32> to vector<16x32xf32>
    %14 = arith.addf %12, %13 : vector<16x32xf32>
    %cst_13 = arith.constant dense<0.000000e+00> : vector<16xf32>
    %15 = vector.multi_reduction <add>, %14, %cst_13 [1] : vector<16x32xf32> to vector<16xf32>
    %16 = vector.shape_cast %15 : vector<16xf32> to vector<16x1xf32>
    %cst_14 = arith.constant 3.200000e+01 : f32
    %17 = vector.broadcast %cst_14 : f32 to vector<16x1xf32>
    %18 = arith.divf %16, %17 : vector<16x1xf32>
    %19 = vector.broadcast %18 : vector<16x1xf32> to vector<16x32xf32>
    %20 = arith.subf %14, %19 : vector<16x32xf32>
    %21 = arith.mulf %20, %20 : vector<16x32xf32>
    %cst_15 = arith.constant dense<0.000000e+00> : vector<16xf32>
    %22 = vector.multi_reduction <add>, %21, %cst_15 [1] : vector<16x32xf32> to vector<16xf32>
    %23 = vector.shape_cast %22 : vector<16xf32> to vector<16x1xf32>
    %cst_16 = arith.constant 3.200000e+01 : f32
    %24 = vector.broadcast %cst_16 : f32 to vector<16x1xf32>
    %25 = arith.divf %23, %24 : vector<16x1xf32>
    %cst_17 = arith.constant 9.99999997E-7 : f32
    %26 = vector.broadcast %cst_17 : f32 to vector<16x1xf32>
    %27 = arith.addf %25, %26 : vector<16x1xf32>
    %28 = math.rsqrt %27 : vector<16x1xf32>
    %29 = vector.broadcast %28 : vector<16x1xf32> to vector<16x32xf32>
    %30 = arith.mulf %20, %29 : vector<16x32xf32>
    %31 = vector.broadcast %8 : vector<1x32xf32> to vector<16x32xf32>
    %32 = arith.mulf %30, %31 : vector<16x32xf32>
    %33 = vector.broadcast %9 : vector<1x32xf32> to vector<16x32xf32>
    %34 = arith.addf %32, %33 : vector<16x32xf32>
    %cst_18 = arith.constant 5.000000e-01 : f32
    %35 = vector.broadcast %cst_18 : f32 to vector<16x32xf32>
    %36 = arith.mulf %35, %34 : vector<16x32xf32>
    %cst_19 = arith.constant 0.707106769 : f32
    %37 = vector.broadcast %cst_19 : f32 to vector<16x32xf32>
    %38 = arith.mulf %34, %37 : vector<16x32xf32>
    %39 = math.absf %38 : vector<16x32xf32>
    %cst_20 = arith.constant 0.327591091 : f32
    %40 = vector.broadcast %cst_20 : f32 to vector<16x32xf32>
    %41 = arith.mulf %40, %39 : vector<16x32xf32>
    %cst_21 = arith.constant 1.000000e+00 : f32
    %42 = vector.broadcast %cst_21 : f32 to vector<16x32xf32>
    %43 = arith.addf %42, %41 : vector<16x32xf32>
    %cst_22 = arith.constant 1.000000e+00 : f32
    %44 = vector.broadcast %cst_22 : f32 to vector<16x32xf32>
    %45 = arith.divf %44, %43 : vector<16x32xf32>
    %cst_23 = arith.constant 1.06140542 : f32
    %46 = vector.broadcast %cst_23 : f32 to vector<16x32xf32>
    %47 = arith.mulf %46, %45 : vector<16x32xf32>
    %cst_24 = arith.constant -1.45315206 : f32
    %48 = vector.broadcast %cst_24 : f32 to vector<16x32xf32>
    %49 = arith.addf %47, %48 : vector<16x32xf32>
    %50 = arith.mulf %49, %45 : vector<16x32xf32>
    %cst_25 = arith.constant 1.42141378 : f32
    %51 = vector.broadcast %cst_25 : f32 to vector<16x32xf32>
    %52 = arith.addf %50, %51 : vector<16x32xf32>
    %53 = arith.mulf %52, %45 : vector<16x32xf32>
    %cst_26 = arith.constant -0.284496725 : f32
    %54 = vector.broadcast %cst_26 : f32 to vector<16x32xf32>
    %55 = arith.addf %53, %54 : vector<16x32xf32>
    %56 = arith.mulf %55, %45 : vector<16x32xf32>
    %cst_27 = arith.constant 0.254829586 : f32
    %57 = vector.broadcast %cst_27 : f32 to vector<16x32xf32>
    %58 = arith.addf %56, %57 : vector<16x32xf32>
    %59 = arith.mulf %58, %45 : vector<16x32xf32>
    %60 = arith.mulf %39, %39 : vector<16x32xf32>
    %cst_28 = arith.constant 0.000000e+00 : f32
    %61 = vector.broadcast %cst_28 : f32 to vector<16x32xf32>
    %62 = arith.subf %61, %60 : vector<16x32xf32>
    %63 = math.exp %62 : vector<16x32xf32>
    %64 = arith.mulf %59, %63 : vector<16x32xf32>
    %cst_29 = arith.constant 1.000000e+00 : f32
    %65 = vector.broadcast %cst_29 : f32 to vector<16x32xf32>
    %66 = arith.subf %65, %64 : vector<16x32xf32>
    %cst_30 = arith.constant 0.000000e+00 : f32
    %67 = vector.broadcast %cst_30 : f32 to vector<16x32xf32>
    %68 = arith.cmpf oge, %38, %67 : vector<16x32xf32>
    %cst_31 = arith.constant 0.000000e+00 : f32
    %69 = vector.broadcast %cst_31 : f32 to vector<16x32xf32>
    %70 = arith.subf %69, %66 : vector<16x32xf32>
    %71 = arith.select %68, %66, %70 : vector<16x32xi1>, vector<16x32xf32>
    %cst_32 = arith.constant 1.000000e+00 : f32
    %72 = vector.broadcast %cst_32 : f32 to vector<16x32xf32>
    %73 = arith.addf %72, %71 : vector<16x32xf32>
    %74 = arith.mulf %36, %73 : vector<16x32xf32>
    %cst_33 = arith.constant dense<0.000000e+00> : vector<32x16xf32>
    %75 = tpu.matmul %3, %74, %cst_33 {dimension_numbers = #tpu.dot_dimension_numbers<[1], [1], [0], [0], [0, 0, 1, 0], [], []>} : vector<32x32xf32>, vector<16x32xf32>, vector<32x16xf32> -> vector<32x16xf32>
    %76 = vector.broadcast %5 : vector<32x1xf32> to vector<32x16xf32>
    %77 = arith.addf %75, %76 : vector<32x16xf32>
    %c0_34 = arith.constant 0 : index
    %c0_35 = arith.constant 0 : index
    %c0_36 = arith.constant 0 : index
    %c0_37 = arith.constant 0 : index
    %78 = vector.load %arg7[%c0_34, %c0_35, %c0_36, %c0_37] : memref<1x4x32x16xf32, #tpu.memory_space<vmem>>, vector<1x1x32x16xf32>
    %79 = vector.shape_cast %78 : vector<1x1x32x16xf32> to vector<32x16xf32>
    %80 = vector.shape_cast %77 : vector<32x16xf32> to vector<1x1x32x16xf32>
    tpu.vector_store %arg7[%c0_34, %c0_35, %c0_36, %c0_37], %80 {strides = array<i32>} : memref<1x4x32x16xf32, #tpu.memory_space<vmem>>, vector<1x1x32x16xf32>,
    %c1 = arith.constant 1 : index
    %c0_38 = arith.constant 0 : index
    %c0_39 = arith.constant 0 : index
    %81 = vector.load %arg5[%c1, %c0_38, %c0_39] : memref<4x32x32xf32, #tpu.memory_space<vmem>>, vector<1x32x32xf32>
    %82 = vector.shape_cast %81 : vector<1x32x32xf32> to vector<32x32xf32>
    %cst_40 = arith.constant dense<0.000000e+00> : vector<16x32xf32>
    %83 = tpu.matmul %1, %82, %cst_40 {dimension_numbers = #tpu.dot_dimension_numbers<[1], [0], [0], [1], [0, 0, 1, 1], [], []>} : vector<16x32xf32>, vector<32x32xf32>, vector<16x32xf32> -> vector<16x32xf32>
    %84 = vector.broadcast %7 : vector<1x32xf32> to vector<16x32xf32>
    %85 = arith.addf %83, %84 : vector<16x32xf32>
    %cst_41 = arith.constant dense<0.000000e+00> : vector<16xf32>
    %86 = vector.multi_reduction <add>, %85, %cst_41 [1] : vector<16x32xf32> to vector<16xf32>
    %87 = vector.shape_cast %86 : vector<16xf32> to vector<16x1xf32>
    %cst_42 = arith.constant 3.200000e+01 : f32
    %88 = vector.broadcast %cst_42 : f32 to vector<16x1xf32>
    %89 = arith.divf %87, %88 : vector<16x1xf32>
    %90 = vector.broadcast %89 : vector<16x1xf32> to vector<16x32xf32>
    %91 = arith.subf %85, %90 : vector<16x32xf32>
    %92 = arith.mulf %91, %91 : vector<16x32xf32>
    %cst_43 = arith.constant dense<0.000000e+00> : vector<16xf32>
    %93 = vector.multi_reduction <add>, %92, %cst_43 [1] : vector<16x32xf32> to vector<16xf32>
    %94 = vector.shape_cast %93 : vector<16xf32> to vector<16x1xf32>
    %cst_44 = arith.constant 3.200000e+01 : f32
    %95 = vector.broadcast %cst_44 : f32 to vector<16x1xf32>
    %96 = arith.divf %94, %95 : vector<16x1xf32>
    %cst_45 = arith.constant 9.99999997E-7 : f32
    %97 = vector.broadcast %cst_45 : f32 to vector<16x1xf32>
    %98 = arith.addf %96, %97 : vector<16x1xf32>
    %99 = math.rsqrt %98 : vector<16x1xf32>
    %100 = vector.broadcast %99 : vector<16x1xf32> to vector<16x32xf32>
    %101 = arith.mulf %91, %100 : vector<16x32xf32>
    %102 = vector.broadcast %8 : vector<1x32xf32> to vector<16x32xf32>
    %103 = arith.mulf %101, %102 : vector<16x32xf32>
    %104 = vector.broadcast %9 : vector<1x32xf32> to vector<16x32xf32>
    %105 = arith.addf %103, %104 : vector<16x32xf32>
    %cst_46 = arith.constant 5.000000e-01 : f32
    %106 = vector.broadcast %cst_46 : f32 to vector<16x32xf32>
    %107 = arith.mulf %106, %105 : vector<16x32xf32>
    %cst_47 = arith.constant 0.707106769 : f32
    %108 = vector.broadcast %cst_47 : f32 to vector<16x32xf32>
    %109 = arith.mulf %105, %108 : vector<16x32xf32>
    %110 = math.absf %109 : vector<16x32xf32>
    %cst_48 = arith.constant 0.327591091 : f32
    %111 = vector.broadcast %cst_48 : f32 to vector<16x32xf32>
    %112 = arith.mulf %111, %110 : vector<16x32xf32>
    %cst_49 = arith.constant 1.000000e+00 : f32
    %113 = vector.broadcast %cst_49 : f32 to vector<16x32xf32>
    %114 = arith.addf %113, %112 : vector<16x32xf32>
    %cst_50 = arith.constant 1.000000e+00 : f32
    %115 = vector.broadcast %cst_50 : f32 to vector<16x32xf32>
    %116 = arith.divf %115, %114 : vector<16x32xf32>
    %cst_51 = arith.constant 1.06140542 : f32
    %117 = vector.broadcast %cst_51 : f32 to vector<16x32xf32>
    %118 = arith.mulf %117, %116 : vector<16x32xf32>
    %cst_52 = arith.constant -1.45315206 : f32
    %119 = vector.broadcast %cst_52 : f32 to vector<16x32xf32>
    %120 = arith.addf %118, %119 : vector<16x32xf32>
    %121 = arith.mulf %120, %116 : vector<16x32xf32>
    %cst_53 = arith.constant 1.42141378 : f32
    %122 = vector.broadcast %cst_53 : f32 to vector<16x32xf32>
    %123 = arith.addf %121, %122 : vector<16x32xf32>
    %124 = arith.mulf %123, %116 : vector<16x32xf32>
    %cst_54 = arith.constant -0.284496725 : f32
    %125 = vector.broadcast %cst_54 : f32 to vector<16x32xf32>
    %126 = arith.addf %124, %125 : vector<16x32xf32>
    %127 = arith.mulf %126, %116 : vector<16x32xf32>
    %cst_55 = arith.constant 0.254829586 : f32
    %128 = vector.broadcast %cst_55 : f32 to vector<16x32xf32>
    %129 = arith.addf %127, %128 : vector<16x32xf32>
    %130 = arith.mulf %129, %116 : vector<16x32xf32>
    %131 = arith.mulf %110, %110 : vector<16x32xf32>
    %cst_56 = arith.constant 0.000000e+00 : f32
    %132 = vector.broadcast %cst_56 : f32 to vector<16x32xf32>
    %133 = arith.subf %132, %131 : vector<16x32xf32>
    %134 = math.exp %133 : vector<16x32xf32>
    %135 = arith.mulf %130, %134 : vector<16x32xf32>
    %cst_57 = arith.constant 1.000000e+00 : f32
    %136 = vector.broadcast %cst_57 : f32 to vector<16x32xf32>
    %137 = arith.subf %136, %135 : vector<16x32xf32>
    %cst_58 = arith.constant 0.000000e+00 : f32
    %138 = vector.broadcast %cst_58 : f32 to vector<16x32xf32>
    %139 = arith.cmpf oge, %109, %138 : vector<16x32xf32>
    %cst_59 = arith.constant 0.000000e+00 : f32
    %140 = vector.broadcast %cst_59 : f32 to vector<16x32xf32>
    %141 = arith.subf %140, %137 : vector<16x32xf32>
    %142 = arith.select %139, %137, %141 : vector<16x32xi1>, vector<16x32xf32>
    %cst_60 = arith.constant 1.000000e+00 : f32
    %143 = vector.broadcast %cst_60 : f32 to vector<16x32xf32>
    %144 = arith.addf %143, %142 : vector<16x32xf32>
    %145 = arith.mulf %107, %144 : vector<16x32xf32>
    %cst_61 = arith.constant dense<0.000000e+00> : vector<32x16xf32>
    %146 = tpu.matmul %3, %145, %cst_61 {dimension_numbers = #tpu.dot_dimension_numbers<[1], [1], [0], [0], [0, 0, 1, 0], [], []>} : vector<32x32xf32>, vector<16x32xf32>, vector<32x16xf32> -> vector<32x16xf32>
    %147 = vector.broadcast %5 : vector<32x1xf32> to vector<32x16xf32>
    %148 = arith.addf %146, %147 : vector<32x16xf32>
    %c0_62 = arith.constant 0 : index
    %c1_63 = arith.constant 1 : index
    %c0_64 = arith.constant 0 : index
    %c0_65 = arith.constant 0 : index
    %149 = vector.load %arg7[%c0_62, %c1_63, %c0_64, %c0_65] : memref<1x4x32x16xf32, #tpu.memory_space<vmem>>, vector<1x1x32x16xf32>
    %150 = vector.shape_cast %149 : vector<1x1x32x16xf32> to vector<32x16xf32>
    %151 = vector.shape_cast %148 : vector<32x16xf32> to vector<1x1x32x16xf32>
    tpu.vector_store %arg7[%c0_62, %c1_63, %c0_64, %c0_65], %151 {strides = array<i32>} : memref<1x4x32x16xf32, #tpu.memory_space<vmem>>, vector<1x1x32x16xf32>,
    %c2 = arith.constant 2 : index
    %c0_66 = arith.constant 0 : index
    %c0_67 = arith.constant 0 : index
    %152 = vector.load %arg5[%c2, %c0_66, %c0_67] : memref<4x32x32xf32, #tpu.memory_space<vmem>>, vector<1x32x32xf32>
    %153 = vector.shape_cast %152 : vector<1x32x32xf32> to vector<32x32xf32>
    %cst_68 = arith.constant dense<0.000000e+00> : vector<16x32xf32>
    %154 = tpu.matmul %1, %153, %cst_68 {dimension_numbers = #tpu.dot_dimension_numbers<[1], [0], [0], [1], [0, 0, 1, 1], [], []>} : vector<16x32xf32>, vector<32x32xf32>, vector<16x32xf32> -> vector<16x32xf32>
    %155 = vector.broadcast %7 : vector<1x32xf32> to vector<16x32xf32>
    %156 = arith.addf %154, %155 : vector<16x32xf32>
    %cst_69 = arith.constant dense<0.000000e+00> : vector<16xf32>
    %157 = vector.multi_reduction <add>, %156, %cst_69 [1] : vector<16x32xf32> to vector<16xf32>
    %158 = vector.shape_cast %157 : vector<16xf32> to vector<16x1xf32>
    %cst_70 = arith.constant 3.200000e+01 : f32
    %159 = vector.broadcast %cst_70 : f32 to vector<16x1xf32>
    %160 = arith.divf %158, %159 : vector<16x1xf32>
    %161 = vector.broadcast %160 : vector<16x1xf32> to vector<16x32xf32>
    %162 = arith.subf %156, %161 : vector<16x32xf32>
    %163 = arith.mulf %162, %162 : vector<16x32xf32>
    %cst_71 = arith.constant dense<0.000000e+00> : vector<16xf32>
    %164 = vector.multi_reduction <add>, %163, %cst_71 [1] : vector<16x32xf32> to vector<16xf32>
    %165 = vector.shape_cast %164 : vector<16xf32> to vector<16x1xf32>
    %cst_72 = arith.constant 3.200000e+01 : f32
    %166 = vector.broadcast %cst_72 : f32 to vector<16x1xf32>
    %167 = arith.divf %165, %166 : vector<16x1xf32>
    %cst_73 = arith.constant 9.99999997E-7 : f32
    %168 = vector.broadcast %cst_73 : f32 to vector<16x1xf32>
    %169 = arith.addf %167, %168 : vector<16x1xf32>
    %170 = math.rsqrt %169 : vector<16x1xf32>
    %171 = vector.broadcast %170 : vector<16x1xf32> to vector<16x32xf32>
    %172 = arith.mulf %162, %171 : vector<16x32xf32>
    %173 = vector.broadcast %8 : vector<1x32xf32> to vector<16x32xf32>
    %174 = arith.mulf %172, %173 : vector<16x32xf32>
    %175 = vector.broadcast %9 : vector<1x32xf32> to vector<16x32xf32>
    %176 = arith.addf %174, %175 : vector<16x32xf32>
    %cst_74 = arith.constant 5.000000e-01 : f32
    %177 = vector.broadcast %cst_74 : f32 to vector<16x32xf32>
    %178 = arith.mulf %177, %176 : vector<16x32xf32>
    %cst_75 = arith.constant 0.707106769 : f32
    %179 = vector.broadcast %cst_75 : f32 to vector<16x32xf32>
    %180 = arith.mulf %176, %179 : vector<16x32xf32>
    %181 = math.absf %180 : vector<16x32xf32>
    %cst_76 = arith.constant 0.327591091 : f32
    %182 = vector.broadcast %cst_76 : f32 to vector<16x32xf32>
    %183 = arith.mulf %182, %181 : vector<16x32xf32>
    %cst_77 = arith.constant 1.000000e+00 : f32
    %184 = vector.broadcast %cst_77 : f32 to vector<16x32xf32>
    %185 = arith.addf %184, %183 : vector<16x32xf32>
    %cst_78 = arith.constant 1.000000e+00 : f32
    %186 = vector.broadcast %cst_78 : f32 to vector<16x32xf32>
    %187 = arith.divf %186, %185 : vector<16x32xf32>
    %cst_79 = arith.constant 1.06140542 : f32
    %188 = vector.broadcast %cst_79 : f32 to vector<16x32xf32>
    %189 = arith.mulf %188, %187 : vector<16x32xf32>
    %cst_80 = arith.constant -1.45315206 : f32
    %190 = vector.broadcast %cst_80 : f32 to vector<16x32xf32>
    %191 = arith.addf %189, %190 : vector<16x32xf32>
    %192 = arith.mulf %191, %187 : vector<16x32xf32>
    %cst_81 = arith.constant 1.42141378 : f32
    %193 = vector.broadcast %cst_81 : f32 to vector<16x32xf32>
    %194 = arith.addf %192, %193 : vector<16x32xf32>
    %195 = arith.mulf %194, %187 : vector<16x32xf32>
    %cst_82 = arith.constant -0.284496725 : f32
    %196 = vector.broadcast %cst_82 : f32 to vector<16x32xf32>
    %197 = arith.addf %195, %196 : vector<16x32xf32>
    %198 = arith.mulf %197, %187 : vector<16x32xf32>
    %cst_83 = arith.constant 0.254829586 : f32
    %199 = vector.broadcast %cst_83 : f32 to vector<16x32xf32>
    %200 = arith.addf %198, %199 : vector<16x32xf32>
    %201 = arith.mulf %200, %187 : vector<16x32xf32>
    %202 = arith.mulf %181, %181 : vector<16x32xf32>
    %cst_84 = arith.constant 0.000000e+00 : f32
    %203 = vector.broadcast %cst_84 : f32 to vector<16x32xf32>
    %204 = arith.subf %203, %202 : vector<16x32xf32>
    %205 = math.exp %204 : vector<16x32xf32>
    %206 = arith.mulf %201, %205 : vector<16x32xf32>
    %cst_85 = arith.constant 1.000000e+00 : f32
    %207 = vector.broadcast %cst_85 : f32 to vector<16x32xf32>
    %208 = arith.subf %207, %206 : vector<16x32xf32>
    %cst_86 = arith.constant 0.000000e+00 : f32
    %209 = vector.broadcast %cst_86 : f32 to vector<16x32xf32>
    %210 = arith.cmpf oge, %180, %209 : vector<16x32xf32>
    %cst_87 = arith.constant 0.000000e+00 : f32
    %211 = vector.broadcast %cst_87 : f32 to vector<16x32xf32>
    %212 = arith.subf %211, %208 : vector<16x32xf32>
    %213 = arith.select %210, %208, %212 : vector<16x32xi1>, vector<16x32xf32>
    %cst_88 = arith.constant 1.000000e+00 : f32
    %214 = vector.broadcast %cst_88 : f32 to vector<16x32xf32>
    %215 = arith.addf %214, %213 : vector<16x32xf32>
    %216 = arith.mulf %178, %215 : vector<16x32xf32>
    %cst_89 = arith.constant dense<0.000000e+00> : vector<32x16xf32>
    %217 = tpu.matmul %3, %216, %cst_89 {dimension_numbers = #tpu.dot_dimension_numbers<[1], [1], [0], [0], [0, 0, 1, 0], [], []>} : vector<32x32xf32>, vector<16x32xf32>, vector<32x16xf32> -> vector<32x16xf32>
    %218 = vector.broadcast %5 : vector<32x1xf32> to vector<32x16xf32>
    %219 = arith.addf %217, %218 : vector<32x16xf32>
    %c0_90 = arith.constant 0 : index
    %c2_91 = arith.constant 2 : index
    %c0_92 = arith.constant 0 : index
    %c0_93 = arith.constant 0 : index
    %220 = vector.load %arg7[%c0_90, %c2_91, %c0_92, %c0_93] : memref<1x4x32x16xf32, #tpu.memory_space<vmem>>, vector<1x1x32x16xf32>
    %221 = vector.shape_cast %220 : vector<1x1x32x16xf32> to vector<32x16xf32>
    %222 = vector.shape_cast %219 : vector<32x16xf32> to vector<1x1x32x16xf32>
    tpu.vector_store %arg7[%c0_90, %c2_91, %c0_92, %c0_93], %222 {strides = array<i32>} : memref<1x4x32x16xf32, #tpu.memory_space<vmem>>, vector<1x1x32x16xf32>,
    %c3 = arith.constant 3 : index
    %c0_94 = arith.constant 0 : index
    %c0_95 = arith.constant 0 : index
    %223 = vector.load %arg5[%c3, %c0_94, %c0_95] : memref<4x32x32xf32, #tpu.memory_space<vmem>>, vector<1x32x32xf32>
    %224 = vector.shape_cast %223 : vector<1x32x32xf32> to vector<32x32xf32>
    %cst_96 = arith.constant dense<0.000000e+00> : vector<16x32xf32>
    %225 = tpu.matmul %1, %224, %cst_96 {dimension_numbers = #tpu.dot_dimension_numbers<[1], [0], [0], [1], [0, 0, 1, 1], [], []>} : vector<16x32xf32>, vector<32x32xf32>, vector<16x32xf32> -> vector<16x32xf32>
    %226 = vector.broadcast %7 : vector<1x32xf32> to vector<16x32xf32>
    %227 = arith.addf %225, %226 : vector<16x32xf32>
    %cst_97 = arith.constant dense<0.000000e+00> : vector<16xf32>
    %228 = vector.multi_reduction <add>, %227, %cst_97 [1] : vector<16x32xf32> to vector<16xf32>
    %229 = vector.shape_cast %228 : vector<16xf32> to vector<16x1xf32>
    %cst_98 = arith.constant 3.200000e+01 : f32
    %230 = vector.broadcast %cst_98 : f32 to vector<16x1xf32>
    %231 = arith.divf %229, %230 : vector<16x1xf32>
    %232 = vector.broadcast %231 : vector<16x1xf32> to vector<16x32xf32>
    %233 = arith.subf %227, %232 : vector<16x32xf32>
    %234 = arith.mulf %233, %233 : vector<16x32xf32>
    %cst_99 = arith.constant dense<0.000000e+00> : vector<16xf32>
    %235 = vector.multi_reduction <add>, %234, %cst_99 [1] : vector<16x32xf32> to vector<16xf32>
    %236 = vector.shape_cast %235 : vector<16xf32> to vector<16x1xf32>
    %cst_100 = arith.constant 3.200000e+01 : f32
    %237 = vector.broadcast %cst_100 : f32 to vector<16x1xf32>
    %238 = arith.divf %236, %237 : vector<16x1xf32>
    %cst_101 = arith.constant 9.99999997E-7 : f32
    %239 = vector.broadcast %cst_101 : f32 to vector<16x1xf32>
    %240 = arith.addf %238, %239 : vector<16x1xf32>
    %241 = math.rsqrt %240 : vector<16x1xf32>
    %242 = vector.broadcast %241 : vector<16x1xf32> to vector<16x32xf32>
    %243 = arith.mulf %233, %242 : vector<16x32xf32>
    %244 = vector.broadcast %8 : vector<1x32xf32> to vector<16x32xf32>
    %245 = arith.mulf %243, %244 : vector<16x32xf32>
    %246 = vector.broadcast %9 : vector<1x32xf32> to vector<16x32xf32>
    %247 = arith.addf %245, %246 : vector<16x32xf32>
    %cst_102 = arith.constant 5.000000e-01 : f32
    %248 = vector.broadcast %cst_102 : f32 to vector<16x32xf32>
    %249 = arith.mulf %248, %247 : vector<16x32xf32>
    %cst_103 = arith.constant 0.707106769 : f32
    %250 = vector.broadcast %cst_103 : f32 to vector<16x32xf32>
    %251 = arith.mulf %247, %250 : vector<16x32xf32>
    %252 = math.absf %251 : vector<16x32xf32>
    %cst_104 = arith.constant 0.327591091 : f32
    %253 = vector.broadcast %cst_104 : f32 to vector<16x32xf32>
    %254 = arith.mulf %253, %252 : vector<16x32xf32>
    %cst_105 = arith.constant 1.000000e+00 : f32
    %255 = vector.broadcast %cst_105 : f32 to vector<16x32xf32>
    %256 = arith.addf %255, %254 : vector<16x32xf32>
    %cst_106 = arith.constant 1.000000e+00 : f32
    %257 = vector.broadcast %cst_106 : f32 to vector<16x32xf32>
    %258 = arith.divf %257, %256 : vector<16x32xf32>
    %cst_107 = arith.constant 1.06140542 : f32
    %259 = vector.broadcast %cst_107 : f32 to vector<16x32xf32>
    %260 = arith.mulf %259, %258 : vector<16x32xf32>
    %cst_108 = arith.constant -1.45315206 : f32
    %261 = vector.broadcast %cst_108 : f32 to vector<16x32xf32>
    %262 = arith.addf %260, %261 : vector<16x32xf32>
    %263 = arith.mulf %262, %258 : vector<16x32xf32>
    %cst_109 = arith.constant 1.42141378 : f32
    %264 = vector.broadcast %cst_109 : f32 to vector<16x32xf32>
    %265 = arith.addf %263, %264 : vector<16x32xf32>
    %266 = arith.mulf %265, %258 : vector<16x32xf32>
    %cst_110 = arith.constant -0.284496725 : f32
    %267 = vector.broadcast %cst_110 : f32 to vector<16x32xf32>
    %268 = arith.addf %266, %267 : vector<16x32xf32>
    %269 = arith.mulf %268, %258 : vector<16x32xf32>
    %cst_111 = arith.constant 0.254829586 : f32
    %270 = vector.broadcast %cst_111 : f32 to vector<16x32xf32>
    %271 = arith.addf %269, %270 : vector<16x32xf32>
    %272 = arith.mulf %271, %258 : vector<16x32xf32>
    %273 = arith.mulf %252, %252 : vector<16x32xf32>
    %cst_112 = arith.constant 0.000000e+00 : f32
    %274 = vector.broadcast %cst_112 : f32 to vector<16x32xf32>
    %275 = arith.subf %274, %273 : vector<16x32xf32>
    %276 = math.exp %275 : vector<16x32xf32>
    %277 = arith.mulf %272, %276 : vector<16x32xf32>
    %cst_113 = arith.constant 1.000000e+00 : f32
    %278 = vector.broadcast %cst_113 : f32 to vector<16x32xf32>
    %279 = arith.subf %278, %277 : vector<16x32xf32>
    %cst_114 = arith.constant 0.000000e+00 : f32
    %280 = vector.broadcast %cst_114 : f32 to vector<16x32xf32>
    %281 = arith.cmpf oge, %251, %280 : vector<16x32xf32>
    %cst_115 = arith.constant 0.000000e+00 : f32
    %282 = vector.broadcast %cst_115 : f32 to vector<16x32xf32>
    %283 = arith.subf %282, %279 : vector<16x32xf32>
    %284 = arith.select %281, %279, %283 : vector<16x32xi1>, vector<16x32xf32>
    %cst_116 = arith.constant 1.000000e+00 : f32
    %285 = vector.broadcast %cst_116 : f32 to vector<16x32xf32>
    %286 = arith.addf %285, %284 : vector<16x32xf32>
    %287 = arith.mulf %249, %286 : vector<16x32xf32>
    %cst_117 = arith.constant dense<0.000000e+00> : vector<32x16xf32>
    %288 = tpu.matmul %3, %287, %cst_117 {dimension_numbers = #tpu.dot_dimension_numbers<[1], [1], [0], [0], [0, 0, 1, 0], [], []>} : vector<32x32xf32>, vector<16x32xf32>, vector<32x16xf32> -> vector<32x16xf32>
    %289 = vector.broadcast %5 : vector<32x1xf32> to vector<32x16xf32>
    %290 = arith.addf %288, %289 : vector<32x16xf32>
    %c0_118 = arith.constant 0 : index
    %c3_119 = arith.constant 3 : index
    %c0_120 = arith.constant 0 : index
    %c0_121 = arith.constant 0 : index
    %291 = vector.load %arg7[%c0_118, %c3_119, %c0_120, %c0_121] : memref<1x4x32x16xf32, #tpu.memory_space<vmem>>, vector<1x1x32x16xf32>
    %292 = vector.shape_cast %291 : vector<1x1x32x16xf32> to vector<32x16xf32>
    %293 = vector.shape_cast %290 : vector<32x16xf32> to vector<1x1x32x16xf32>
    tpu.vector_store %arg7[%c0_118, %c3_119, %c0_120, %c0_121], %293 {strides = array<i32>} : memref<1x4x32x16xf32, #tpu.memory_space<vmem>>, vector<1x1x32x16xf32>,
    return
  }
  func.func @transform_0(%arg0: i32, %arg1: i32) -> (i32, i32, i32) {
    %c0_i32 = arith.constant 0 : i32
    %c0_i32_0 = arith.constant 0 : i32
    return %arg0, %arg1, %c0_i32 : i32, i32, i32
  }
  func.func @transform_1(%arg0: i32, %arg1: i32) -> (i32, i32, i32) {
    %c0_i32 = arith.constant 0 : i32
    %c0_i32_0 = arith.constant 0 : i32
    %c0_i32_1 = arith.constant 0 : i32
    return %arg0, %c0_i32, %c0_i32_0 : i32, i32, i32
  }
  func.func @transform_2(%arg0: i32, %arg1: i32) -> (i32, i32, i32) {
    %c0_i32 = arith.constant 0 : i32
    %c0_i32_0 = arith.constant 0 : i32
    %c0_i32_1 = arith.constant 0 : i32
    return %arg0, %c0_i32, %c0_i32_0 : i32, i32, i32
  }
  func.func @transform_3(%arg0: i32, %arg1: i32) -> (i32, i32, i32) {
    %c0_i32 = arith.constant 0 : i32
    %c0_i32_0 = arith.constant 0 : i32
    %c0_i32_1 = arith.constant 0 : i32
    %c0_i32_2 = arith.constant 0 : i32
    return %c0_i32, %c0_i32_0, %c0_i32_1 : i32, i32, i32
  }
  func.func @transform_4(%arg0: i32, %arg1: i32) -> (i32, i32) {
    %c0_i32 = arith.constant 0 : i32
    %c0_i32_0 = arith.constant 0 : i32
    %c0_i32_1 = arith.constant 0 : i32
    return %c0_i32, %c0_i32_0 : i32, i32
  }
  func.func @transform_5(%arg0: i32, %arg1: i32) -> (i32, i32, i32, i32) {
    %c0_i32 = arith.constant 0 : i32
    %c0_i32_0 = arith.constant 0 : i32
    %c0_i32_1 = arith.constant 0 : i32
    return %arg0, %c0_i32, %c0_i32_0, %arg1 : i32, i32, i32, i32
  }
}

</mosaic_0001>

<bundles_post_ra>
// kernel: tpu_custom_call.1
= control target key start
LH: loop header
LB: loop body
LE: loop exit
PB: predicated region body
PF: predicated region fallthrough
CT: control target
= control target key end

     0   :  { %10 = vsyncpa [#allocation3], 0  ;;  %s2565_s0 = inlined_call_operand.hbm [shape: f32[2,16,32], index: 0, kind: input, shape index: {}]   ;;  %s2566_s1 = inlined_call_operand.vmem [shape: f32[2,32,32], index: 1, kind: input, shape index: {}]   ;;  %s2567_s2 = inlined_call_operand.vmem [shape: f32[2,32,1], index: 2, kind: input, shape index: {}]   ;;  %s2568_s3 = inlined_call_operand.hbm [shape: f32[4,32,32], index: 3, kind: input, shape index: {}]   ;;  %s2569_s4 = inlined_call_operand.vmem [shape: f32[3,32], index: 4, kind: input, shape index: {}]   ;;  %s2570_s5 = inlined_call_operand.vmem [shape: f32[2,4,32,16], index: 5, kind: output, shape index: {}]  }
   0x1   :  { %12 = vsyncpa [#allocation3 + $0x1], 0 }
   0x2   :  { %13 = vsyncpa [#allocation5], 0  ;;  %s2076_s18 = smov 0   ;;  %s2078_s19 = smov 0  }
   0x3   :  { %s2080_s20 = smov 0   ;;  %s2082_s21 = smov 0  }
   0x4   :  { %s2084_s22 = smov 0   ;;  %s2086_s23 = smov 0  }
   0x5 LB: > { %s1553_s24 = sadd.s32 4294967295, %s2039_s23   ;;  %p53_p0 = scmp.ne.s32.totalorder %s2023_s19, %s2019_s18  ;;  %s2039_s23 = sphi %s2086_s23, %s19_s23   ;;  %s2035_s22 = sphi %s2084_s22, %s2589_s22   ;;  %s2031_s21 = sphi %s2082_s21, %s2588_s21   ;;  %s2027_s20 = sphi %s2080_s20, %s2587_s20   ;;  %s2023_s19 = sphi %s2078_s19, %s2586_s19   ;;  %s2019_s18 = sphi %s2076_s18, %s2585_s18  }
   0x6   : > { %p2106_p1 = scmp.eq.s32.totalorder %s1553_s24, 0  ;;  %p1555_p2 = scmp.ge.s32.totalorder %s2039_s23, 1 }
   0x7   : > { %p186_p3 = scmp.lt.s32.totalorder %s2039_s23, 3  ;;  %s2041_s28 = smov [#allocation4]  }
   0x8   : > { %s2575_s25 = scalar_select %p2106_p1, 1, 0 }
   0x9   : > { %p2114_p4 = por %p2106_p1, %p53_p0  ;;  %p2118_p5 = pnand %p1555_p2, %p186_p3 }
   0xa   : > { %s198_s29 = sshll.u32 %s2041_s28, 4  ;;  %s31_s6 = sadd.s32 1, %s2035_s22  ;;  %s199_s29 = int_to_ptr.vmem [resolvable:$true] %s198_s29 }
   0xb   : > { %s2576_s26 = scalar_select %p2114_p4, 1, 0 }
   0xc   : > { %s2577_s27 = scalar_select %p2118_p5, 1, 0 }
   0xd   : > { %p1814_p6 = pneg %p2118_p5  ;;  %s1927_s9 = scalar_lea.hbm %s2568_s3, 2048 }
   0xe   : > { %p1928_p8 = scmp.ne.s32.totalorder %s2568_s3, %s1927_s9  ;;  %p1934_p12 = scmp.lt.u32.totalorder %s1927_s9, %s2568_s3 }
   0xf   : > { %p2126_p7 = pnand %p1814_p6, %p2106_p1 }
  0x11   : > { %p1929_p9 = pneg %p2126_p7 }
  0x13   : > { %p1930_p10 = pnand %p1929_p9, %p1928_p8 }
  0x15   : > { %p1931_p11 = pneg %p1930_p10 }
  0x17   : > { %p1936_p13 = pnand %p1934_p12, %p1931_p11 }
  0x19   : > { %1939 = shalt.err (!%p1936_p13)
}
  0x1a   : > { %s1940_s14 = scalar_lea.vmem %s199_s29, 2048  ;;  %p1948_p6 = scmp.lt.s32.totalorder %s199_s29, %s199_s29 }
  0x1b   : > { %p1941_p0 = scmp.ne.s32.totalorder %s199_s29, %s1940_s14  ;;  %p1949_p1 = scmp.lt.s32.totalorder %s1940_s14, %s1940_s14 }
  0x1d   : > { %p1943_p2 = pnand %p1941_p0, %p1929_p9  ;;  %p1950_p4 = por %p1949_p1, %p1948_p6 }
  0x1f   : > { %p1944_p3 = pneg %p1943_p2 }
  0x21   : > { %p1951_p5 = pnand %p1950_p4, %p1944_p3 }
  0x23   : > { %1954 = shalt.err (!%p1951_p5)
}
  0x24   : > { %s2042_s15 = smov 128   ;;  %s2043_s16 = smov 8  }
  0x25   : > { %1817 = dma.hbm_to_vmem [thread:$0]  (!%p2126_p7), %s2568_s3, 2048, %s199_s29, [#allocation5], %s2042_s15, %s2042_s15, %s2043_s16  }
  0x26   : > { %p33_p1 = scmp.ge.s32.totalorder %s31_s6, 2  ;;  %s40_s24 = sadd.s32 1, %s2027_s20 }
  0x27   : > { %p47_p4 = scmp.ne.s32.totalorder %s2027_s20, %s2023_s19  ;;  %p48_p5 = scmp.eq.s32.totalorder %s2039_s23, 0 }
  0x28   : > { %s2591_s6 = smov (%p33_p1, %s31_s6), 0  ;;  %p1823_p9 = scmp.lt.s32.totalorder %s2039_s23, 2 }
  0x29   : > { %p49_p8 = por %p48_p5, %p47_p4  ;;  %s35_s28 = ssub.s32 %s2035_s22, %s2591_s6 }
  0x2a   : > { %s215_s7 = sand.u32 1, %s2027_s20   ;;  %p38_p10 = scmp.eq.s32.totalorder %s35_s28, 0 }
  0x2b   : > { %s1558_s30 = sshll.u32 %s215_s7, 4  ;;  %s1616_s8 = sshll.u32 %s2035_s22, 8 }
  0x2c   : > { %s2162_s9 = scalar_select %p38_p10, %s2027_s20, %s40_s24  }
  0x2d   : > { %s2167_s29 = scalar_lea.hbm %s2565_s0, %s1616_s8  ;;  %s219_s12 = scalar_lea.vmem [#allocation2], %s1558_s30 }
  0x2e   : > { %s228_s13 = sshll.u32 %s219_s12, 4  ;;  %p2169_p7 = pnand %p1823_p9, %p49_p8  ;;  %s2173_s13 = int_to_ptr.vmem [resolvable:$true] %s228_s13 }
  0x2f   : > { %s2175_s17 = scalar_lea.sflag [#allocation3], %s215_s7  ;;  %s1955_s18 = scalar_lea.hbm %s2167_s29, 256 }
  0x30   : > { %p1956_p11 = scmp.ne.s32.totalorder %s2167_s29, %s1955_s18  ;;  %p1957_p12 = pneg %p2169_p7 }
  0x31   : > { %s1960_s30 = scalar_lea.hbm %s2565_s0, 512  ;;  %p1961_p2 = scmp.lt.u32.totalorder %s2167_s29, %s2565_s0 }
  0x32   : > { %p1958_p13 = pnand %p1957_p12, %p1956_p11  ;;  %p1962_p3 = scmp.lt.u32.totalorder %s1960_s30, %s1955_s18 }
  0x33   : > { %p1964_p1 = scmp.lt.u32.totalorder %s1955_s18, %s2167_s29 }
  0x34   : > { %p1959_p0 = pneg %p1958_p13  ;;  %p1963_p6 = por %p1962_p3, %p1961_p2 }
  0x36   : > { %p1965_p4 = por %p1964_p1, %p1963_p6 }
  0x38   : > { %p1966_p5 = pnand %p1965_p4, %p1959_p0 }
  0x3a   : > { %1969 = shalt.err (!%p1966_p5)
}
  0x3b   : > { %s1970_s7 = scalar_lea.vmem %s2173_s13, 256  ;;  %s2044_s11 = smov [#allocation2]  }
  0x3c   : > { %p1971_p8 = scmp.ne.s32.totalorder %s2173_s13, %s1970_s7  ;;  %s1975_s12 = sshll.u32 %s2044_s11, 4  ;;  %s1976_s12 = int_to_ptr.vmem [resolvable:$false] %s1975_s12 }
  0x3d   : > { %s1977_s24 = scalar_lea.vmem %s1976_s12, 512  ;;  %p1978_p11 = scmp.lt.s32.totalorder %s2173_s13, %s1976_s12 }
  0x3e   : > { %p1973_p9 = pnand %p1971_p8, %p1957_p12  ;;  %p1979_p13 = scmp.lt.s32.totalorder %s1977_s24, %s1970_s7 }
  0x40   : > { %p1974_p10 = pneg %p1973_p9  ;;  %p1980_p2 = por %p1979_p13, %p1978_p11 }
  0x42   : > { %p1981_p3 = pnand %p1980_p2, %p1974_p10 }
  0x44   : > { %1984 = shalt.err (!%p1981_p3)
}
  0x45   : > { %1821 = dma.hbm_to_vmem [thread:$0]  (!%p2169_p7), %s2167_s29, 256, %s2173_s13, %s2175_s17, %s2042_s15, %s2042_s15, %s2043_s16  }
  0x46   : > { %p2580_p12 = scmp.ne.s32.totalorder %s2577_s27, 0 }
  0x47   : > { %s258_s18 = sand.u32 (!%p2580_p12), 1, %s2023_s19   ;;  %p2581_p0 = scmp.ne.s32.totalorder (!%p2580_p12), %s2576_s26, 0 }
  0x48   : > { %256 = sbr.rel (%p2580_p12) target bundleno = 928 (0x3a0), region = 40  ;;  %s1562_s28 = sshll.u32 (!%p2580_p12), %s258_s18, 4 }
  0x49   : > { %s259_s30 = scalar_lea.sflag (!%p2580_p12), [#allocation3], %s258_s18  ;;  %s262_s8 = scalar_lea.vmem (!%p2580_p12), [#allocation2], %s1562_s28 }
  0x4f   : > { %2010 = dma.done.wait (%p2581_p0), %s259_s30, 256  }
  0x50   : > { %2012 = vsyncadd (%p2581_p0), %s259_s30, 4294967040  ;;  %p2582_p6 = scmp.ne.s32.totalorder %s2575_s25, 0 }
  0x52   : > { %2014 = dma.done.wait (%p2582_p6), [#allocation5], 2048  }
  0x53   : > { %2016 = vsyncadd (%p2582_p6), [#allocation5], 4294965248  ;;  %vm344_vm0 = vcmask 261120   ;;  %v336_v0 = vld [vmem:[#allocation4] sm:$0xff]  ;;  %v337_v1 = vld [vmem:[#allocation4 + $0x8] sm:$0xff]  ;;  %v340_v26 = vlaneseq  ;;  %p307_p7 = scmp.lt.s32.totalorder %s2031_s21, 1 }
  0x54   : > { %v338_v2 = vld [vmem:[#allocation4 + $0x10] sm:$0xff]  ;;  %v1752_v3 = vpack.c.bf16 %v337_v1, %v336_v0  ;;  %v339_v4 = vld [vmem:[#allocation4 + $0x18] sm:$0xff]  ;;  %v648_v7 = vld [vmem:[#allocation4 + $0x20] sm:$0xff]  ;;  %vm642_vm10 = vcmask 130048  }
  0x55   : > { %v325_v5 = vld [vmem:[%s262_s8] sm:$0xff]  ;;  %v1756_v6 = vpack.c.bf16 %v339_v4, %v338_v2  ;;  %v649_v8 = vld [vmem:[#allocation4 + $0x28] sm:$0xff]  ;;  %v651_v11 = vld [vmem:[#allocation4 + $0x38] sm:$0xff]  ;;  %v2225_v27 = vshrl.u32 %v340_v26, 7  ;;  %s2593_s21 = smov (!%p307_p7, %s2031_s21), 1 }
  0x56   : > { %1676 = vmatprep.mubr.msk.f32.mxu0 %vm344_vm0, %v325_v5  ;;  %1753 = vmatprep.subr.bf16.mxu0 %v1752_v3  ;;  %v1766_v9 = vpack.c.bf16 %v649_v8, %v648_v7  ;;  %v650_v10 = vld [vmem:[#allocation4 + $0x30] sm:$0xff]  ;;  %v326_v12 = vld [vmem:[%s262_s8 + $0x8] sm:$0xff]  ;;  %v908_v14 = vld [vmem:[#allocation4 + $0x40] sm:$0xff]  ;;  %s1617_s27 = sshll.u32 %s2593_s21, 5  ;;  %s1619_s10 = sshll.u32 %s2593_s21, 7 }
  0x57   : > { %1755 = vmatpush3.bf16.msra.mxu0 %v1752_v3  ;;  %v1770_v13 = vpack.c.bf16 %v651_v11, %v650_v10  ;;  %v909_v15 = vld [vmem:[#allocation4 + $0x48] sm:$0xff]  ;;  %v910_v17 = vld [vmem:[#allocation4 + $0x50] sm:$0xff]  ;;  %v911_v18 = vld [vmem:[#allocation4 + $0x58] sm:$0xff]  ;;  %v342_v28 = vsub.s32 0, %v2225_v27  ;;  %s2290_s29 = scalar_lea.vmem %s2566_s1, %s1617_s27  ;;  %s316_s17 = scalar_lea.vmem %s2567_s2, %s1617_s27 }
  0x58   : > { %1757 = vmatprep.subr.bf16.mxu0 %v1756_v6  ;;  %v1780_v16 = vpack.c.bf16 %v909_v15, %v908_v14  ;;  %v1784_v19 = vpack.c.bf16 %v911_v18, %v910_v17  ;;  %v1168_v20 = vld [vmem:[#allocation4 + $0x60] sm:$0xff]  ;;  %v1169_v21 = vld [vmem:[#allocation4 + $0x68] sm:$0xff]  ;;  %v1170_v23 = vld [vmem:[#allocation4 + $0x70] sm:$0xff]  ;;  %s2513_s12 = scalar_lea.vmem %s2570_s5, %s1619_s10 }
  0x59   : > { %v1794_v22 = vpack.c.bf16 %v1169_v21, %v1168_v20  ;;  %v1171_v24 = vld [vmem:[#allocation4 + $0x78] sm:$0xff]  ;;  %v2231_v29 = vld [vmem:[%s2569_s4] sm:$0x7]  ;;  %vm2443_vm4 = vmpackc.low %vm344_vm0, %vm344_vm0 }
  0x5a   : > { %v1798_v25 = vpack.c.bf16 %v1171_v24, %v1170_v23  ;;  %v343_v30 = vrot.slane %v2231_v29, %v342_v28 }
  0x5b   : > { %1759 = vmatpush3.bf16.msra.mxu0 %v1756_v6 }
  0x5c   : > { %1767 = vmatprep.subr.bf16.mxu0 %v1766_v9 }
  0x5e   : > { %1677 = vmatmul.mubr.msk.f32.vlgmr.msra.gmra.mrb[0].mxu0 %vm344_vm0, %v326_v12 }
  0x5f   : > { %1769 = vmatpush3.bf16.msra.mxu0 %v1766_v9  ;;  %1697 = vmatprep.mubr.msk.f32.mxu0 %vm344_vm0, %v325_v5 }
  0x60   : > { %1771 = vmatprep.subr.bf16.mxu0 %v1770_v13 }
  0x63   : > { %1773 = vmatpush3.bf16.msra.mxu0 %v1770_v13 }
  0x64   : > { %1781 = vmatprep.subr.bf16.mxu0 %v1780_v16 }
  0x66   : > { %1698 = vmatmul.mubr.msk.f32.vlgmr.msra.gmra.mrb[2].mxu0 %vm344_vm0, %v326_v12 }
  0x67   : > { %1783 = vmatpush3.bf16.msra.mxu0 %v1780_v16  ;;  %1718 = vmatprep.mubr.msk.f32.mxu0 %vm344_vm0, %v325_v5 }
  0x68   : > { %1785 = vmatprep.subr.bf16.mxu0 %v1784_v19 }
  0x6b   : > { %1787 = vmatpush3.bf16.msra.mxu0 %v1784_v19 }
  0x6c   : > { %1795 = vmatprep.subr.bf16.mxu0 %v1794_v22 }
  0x6e   : > { %1719 = vmatmul.mubr.msk.f32.vlgmr.msra.gmra.mrb[4].mxu0 %vm344_vm0, %v326_v12 }
  0x6f   : > { %1797 = vmatpush3.bf16.msra.mxu0 %v1794_v22  ;;  %1739 = vmatprep.mubr.msk.f32.mxu0 %vm344_vm0, %v325_v5 }
  0x70   : > { %1799 = vmatprep.subr.bf16.mxu0 %v1798_v25 }
  0x73   : > { %1801 = vmatpush3.bf16.msra.mxu0 %v1798_v25 }
  0x76   : > { %1740 = vmatmul.mubr.msk.f32.vlgmr.msra.gmra.mrb[6].mxu0 %vm344_vm0, %v326_v12 }
 0x131   : > { %v1678_v31 = vpop.f32.mrb[0].mxu0 }
 0x132   : > { %v417_v32 = vpop.f32.mrb[1].mxu0  ;;  %v423_v34 = vadd.f32 %v1678_v31, %v343_v30 }
 0x133   : > { %v418_v33 = vadd.f32 %v417_v32, %v343_v30 }
 0x134   : > { %v429_v37 = vsel %vm344_vm0, %v423_v34, 0.0 }
 0x135   : > { %v426_v35 = vsel %vm344_vm0, %v418_v33, 0.0 }
 0x136   : > { %427 = vadd.xlane.f32.xlu0 %v426_v35  ;;  %v332_v35 = vld [vmem:[%s316_s17 + $0x8] sm:$0xff] }
 0x139   : > { %v1699_v36 = vpop.f32.mrb[2].mxu0 }
 0x13a   : > { %v718_v38 = vpop.f32.mrb[3].mxu0  ;;  %430 = vadd.xlane.f32.xlu0 %v429_v37  ;;  %v724_v40 = vadd.f32 %v1699_v36, %v343_v30  ;;  %v331_v36 = vld [vmem:[%s316_s17] sm:$0xff]  ;;  %v333_v37 = vld [vmem:[%s316_s17 + $0x10] sm:$0xff] }
 0x13b   : > { %v719_v39 = vadd.f32 %v718_v38, %v343_v30  ;;  %v334_v38 = vld [vmem:[%s316_s17 + $0x18] sm:$0xff] }
 0x13c   : > { %v730_v43 = vsel %vm344_vm0, %v724_v40, 0.0 }
 0x13d   : > { %v727_v41 = vsel %vm344_vm0, %v719_v39, 0.0 }
 0x13e   : > { %728 = vadd.xlane.f32.xlu1 %v727_v41 }
 0x141   : > { %v1720_v42 = vpop.f32.mrb[4].mxu0 }
 0x142   : > { %v984_v44 = vadd.f32 %v1720_v42, %v343_v30  ;;  %v978_v45 = vpop.f32.mrb[5].mxu0  ;;  %731 = vadd.xlane.f32.xlu1 %v730_v43 }
 0x143   : > { %v979_v46 = vadd.f32 %v978_v45, %v343_v30 }
 0x144   : > { %v990_v47 = vsel %vm344_vm0, %v984_v44, 0.0 }
 0x145   : > { %v987_v48 = vsel %vm344_vm0, %v979_v46, 0.0 }
 0x146   : > { %991 = vadd.xlane.f32.xlu1 %v990_v47  ;;  %988 = vadd.xlane.f32.xlu0 %v987_v48  ;;  %v455_v47 = vsub.s32 1, %v2225_v27 }
 0x149   : > { %v1741_v49 = vpop.f32.mrb[6].mxu0 }
 0x14a   : > { %v1244_v50 = vadd.f32 %v1741_v49, %v343_v30  ;;  %v1238_v51 = vpop.f32.mrb[7].mxu0  ;;  %v461_v49 = vsub.s32 2, %v2225_v27 }
 0x14b   : > { %v1239_v52 = vadd.f32 %v1238_v51, %v343_v30 }
 0x14c   : > { %v1250_v53 = vsel %vm344_vm0, %v1244_v50, 0.0 }
 0x14d   : > { %1251 = vadd.xlane.f32.xlu1 %v1250_v53  ;;  %v1247_v54 = vsel %vm344_vm0, %v1239_v52, 0.0 }
 0x14e   : > { %1248 = vadd.xlane.f32.xlu0 %v1247_v54 }
 0x1c3   : > { %v428_v55 = vpop.xlane.xlu0 %427 }
 0x1c4   : > { %v433_v56 = vmul.f32 0.03125, %v428_v55  ;;  %v2306_v55 = vrot.slane %v2231_v29, %v461_v49 }
 0x1c6   : > { %v2242_v57 = vsub.f32 %v418_v33, %v433_v56  ;;  %v2293_v33 = vld [vmem:[%s2290_s29] sm:$0xff] }
 0x1c7   : > { %v431_v58 = vpop.xlane.xlu0 %430  ;;  %1683 = vmatprep.mubr.msk.f32.mxu1 %vm344_vm0, %v2293_v33 }
 0x1c8   : > { %v434_v59 = vmul.f32 0.03125, %v431_v58  ;;  %v437_v60 = vmul.f32 %v2242_v57, %v2242_v57 }
 0x1ca   : > { %v2246_v61 = vsub.f32 %v423_v34, %v434_v59  ;;  %v439_v62 = vsel %vm344_vm0, %v437_v60, 0.0  ;;  %v2045_v34 = vmov 0  }
 0x1cb   : > { %v729_v63 = vpop.xlane.xlu1 %728  ;;  %440 = vadd.xlane.f32.xlu0 %v439_v62  ;;  %1878 = vset.pattern.permute.xlu1 %v2045_v34 }
 0x1cc   : > { %v733_v0 = vmul.f32 0.03125, %v729_v63  ;;  %v438_v1 = vmul.f32 %v2246_v61, %v2246_v61  ;;  %1877 = vset.pattern.permute.xlu0 %v2045_v34 }
 0x1ce   : > { %v2251_v2 = vsub.f32 %v719_v39, %v733_v0  ;;  %v442_v3 = vsel %vm344_vm0, %v438_v1, 0.0 }
 0x1cf   : > { %v732_v4 = vpop.xlane.xlu1 %731  ;;  %443 = vadd.xlane.f32.xlu1 %v442_v3 }
 0x1d0   : > { %v734_v5 = vmul.f32 0.03125, %v732_v4  ;;  %v737_v6 = vmul.f32 %v2251_v2, %v2251_v2 }
 0x1d2   : > { %v2256_v7 = vsub.f32 %v724_v40, %v734_v5  ;;  %v739_v8 = vsel %vm344_vm0, %v737_v6, 0.0 }
 0x1d3   : > { %v992_v9 = vpop.xlane.xlu1 %991  ;;  %740 = vadd.xlane.f32.xlu0 %v739_v8  ;;  %v989_v10 = vpop.xlane.xlu0 %988 }
 0x1d4   : > { %v994_v11 = vmul.f32 0.03125, %v992_v9  ;;  %v993_v12 = vmul.f32 0.03125, %v989_v10  ;;  %v738_v13 = vmul.f32 %v2256_v7, %v2256_v7 }
 0x1d6   : > { %v2261_v14 = vsub.f32 %v984_v44, %v994_v11  ;;  %v2263_v15 = vsub.f32 %v979_v46, %v993_v12  ;;  %v742_v16 = vsel %vm344_vm0, %v738_v13, 0.0 }
 0x1d7   : > { %743 = vadd.xlane.f32.xlu1 %v742_v16 }
 0x1d8   : > { %v998_v17 = vmul.f32 %v2261_v14, %v2261_v14  ;;  %v997_v18 = vmul.f32 %v2263_v15, %v2263_v15 }
 0x1da   : > { %v1252_v19 = vpop.xlane.xlu1 %1251  ;;  %v1002_v20 = vsel %vm344_vm0, %v998_v17, 0.0  ;;  %v999_v21 = vsel %vm344_vm0, %v997_v18, 0.0 }
 0x1db   : > { %v1254_v22 = vmul.f32 0.03125, %v1252_v19  ;;  %1003 = vadd.xlane.f32.xlu1 %v1002_v20  ;;  %1000 = vadd.xlane.f32.xlu0 %v999_v21  ;;  %v1249_v23 = vpop.xlane.xlu0 %1248 }
 0x1dc   : > { %v1253_v24 = vmul.f32 0.03125, %v1249_v23 }
 0x1dd   : > { %v2272_v25 = vsub.f32 %v1244_v50, %v1254_v22 }
 0x1de   : > { %v2274_v26 = vsub.f32 %v1239_v52, %v1253_v24  ;;  %v2303_v52 = vrot.slane %v2231_v29, %v455_v47 }
 0x1df   : > { %v1258_v28 = vmul.f32 %v2272_v25, %v2272_v25 }
 0x1e0   : > { %v1257_v30 = vmul.f32 %v2274_v26, %v2274_v26 }
 0x1e1   : > { %v1262_v31 = vsel %vm344_vm0, %v1258_v28, 0.0 }
 0x1e2   : > { %1263 = vadd.xlane.f32.xlu1 %v1262_v31  ;;  %v1259_v32 = vsel %vm344_vm0, %v1257_v30, 0.0 }
 0x1e3   : > { %1260 = vadd.xlane.f32.xlu0 %v1259_v32 }
 0x1f3   : > { %526 = vperm.xlu1 %1878, %v332_v35  }
 0x1f7   : > { %531 = vperm.xlu1 %1878, %v333_v37  }
 0x1f9   : > { %521 = vperm.xlu0 %1877, %v331_v36  }
 0x1fb   : > { %536 = vperm.xlu1 %1878, %v334_v38  }
 0x258   : > { %v441_v39 = vpop.xlane.xlu0 %440 }
 0x259   : > { %v445_v40 = vmul.f32 0.03125, %v441_v39 }
 0x25b   : > { %v447_v41 = vadd.f32 1e-06, %v445_v40 }
 0x25c   : > { %v444_v42 = vpop.xlane.xlu1 %443 }
 0x25d   : > { %1879 = vrsqrt.f32 %v447_v41  ;;  %v446_v43 = vmul.f32 0.03125, %v444_v42 }
 0x25f   : > { %v448_v44 = vadd.f32 1e-06, %v446_v43 }
 0x260   : > { %v741_v45 = vpop.xlane.xlu0 %740 }
 0x261   : > { %1881 = vrsqrt.f32 %v448_v44  ;;  %v745_v46 = vmul.f32 0.03125, %v741_v45 }
 0x263   : > { %v747_v48 = vadd.f32 1e-06, %v745_v46 }
 0x264   : > { %v744_v50 = vpop.xlane.xlu1 %743 }
 0x265   : > { %1883 = vrsqrt.f32 %v747_v48  ;;  %v746_v51 = vmul.f32 0.03125, %v744_v50 }
 0x267   : > { %v1880_v53 = vpop.eup %1879  ;;  %v748_v54 = vadd.f32 1e-06, %v746_v51 }
 0x268   : > { %v1004_v56 = vpop.xlane.xlu1 %1003  ;;  %v1001_v58 = vpop.xlane.xlu0 %1000  ;;  %v451_v59 = vmul.f32 %v1880_v53, %v2242_v57 }
 0x269   : > { %1885 = vrsqrt.f32 %v748_v54  ;;  %v1006_v60 = vmul.f32 0.03125, %v1004_v56  ;;  %v1005_v62 = vmul.f32 0.03125, %v1001_v58 }
 0x26a   : > { %v457_v27 = vmul.f32 %v2303_v52, %v451_v59 }
 0x26b   : > { %v1882_v63 = vpop.eup %1881  ;;  %v1008_v0 = vadd.f32 1e-06, %v1006_v60  ;;  %v1007_v1 = vadd.f32 1e-06, %v1005_v62 }
 0x26c   : > { %v452_v3 = vmul.f32 %v1882_v63, %v2246_v61  ;;  %v2312_v4 = vadd.f32 %v2306_v55, %v457_v27 }
 0x26d   : > { %1887 = vrsqrt.f32 %v1008_v0 }
 0x26e   : > { %1889 = vrsqrt.f32 %v1007_v1  ;;  %v458_v29 = vmul.f32 %v2303_v52, %v452_v3  ;;  %v2316_v5 = vmul.f32 0.70710677, %v2312_v4 }
 0x26f   : > { %v1884_v57 = vpop.eup %1883  ;;  %v1264_v6 = vpop.xlane.xlu1 %1263 }
 0x270   : > { %v751_v8 = vmul.f32 %v1884_v57, %v2251_v2  ;;  %v1266_v9 = vmul.f32 0.03125, %v1264_v6  ;;  %v1261_v10 = vpop.xlane.xlu0 %1260  ;;  %v2320_v11 = vadd.f32 %v2306_v55, %v458_v29  ;;  %v469_v61 = vand.u32 2147483647, %v2316_v5 }
 0x271   : > { %v1265_v12 = vmul.f32 0.03125, %v1261_v10  ;;  %vm509_vm1 = vcmp.ge.f32.partialorder %v2316_v5, 0.0 }
 0x272   : > { %v753_v13 = vmul.f32 %v751_v8, %v2303_v52  ;;  %v1268_v16 = vadd.f32 1e-06, %v1266_v9  ;;  %v2325_v17 = vmul.f32 0.70710677, %v2320_v11  ;;  %v471_v20 = vmul.f32 0.3275911, %v469_v61 }
 0x273   : > { %v1886_v18 = vpop.eup %1885  ;;  %v1267_v19 = vadd.f32 1e-06, %v1265_v12 }
 0x274   : > { %v752_v21 = vmul.f32 %v1886_v18, %v2256_v7  ;;  %1891 = vrsqrt.f32 %v1268_v16  ;;  %v470_v2 = vand.u32 2147483647, %v2325_v17  ;;  %v473_v22 = vadd.f32 1.0, %v471_v20 }
 0x275   : > { %1893 = vrsqrt.f32 %v1267_v19  ;;  %v2330_v23 = vadd.f32 %v753_v13, %v2306_v55  ;;  %vm510_vm2 = vcmp.ge.f32.partialorder %v2325_v17, 0.0 }
 0x276   : > { %v754_v24 = vmul.f32 %v752_v21, %v2303_v52  ;;  %v472_v28 = vmul.f32 0.3275911, %v470_v2  ;;  %1895 = vrcp.f32 %v473_v22  ;;  %v498_v48 = vmul.f32 %v470_v2, %v470_v2 }
 0x277   : > { %v1888_v30 = vpop.eup %1887  ;;  %v2334_v31 = vmul.f32 0.70710677, %v2330_v23  ;;  %v2382_v2 = vmul.f32 0.5, %v2312_v4 }
 0x278   : > { %v1890_v32 = vpop.eup %1889  ;;  %v1012_v34 = vmul.f32 %v1888_v30, %v2261_v14  ;;  %v474_v7 = vadd.f32 1.0, %v472_v28  ;;  %v2338_v35 = vadd.f32 %v754_v24, %v2306_v55  ;;  %v497_v14 = vmul.f32 %v469_v61, %v469_v61 }
 0x279   : > { %v1011_v36 = vmul.f32 %v1890_v32, %v2263_v15  ;;  %v761_v37 = vand.u32 2147483647, %v2334_v31  ;;  %v500_v0 = vsub.f32 0.0, %v498_v48  ;;  %v2389_v28 = vmul.f32 0.5, %v2320_v11 }
 0x27a   : > { %v1014_v38 = vmul.f32 %v1012_v34, %v2303_v52  ;;  %1897 = vrcp.f32 %v474_v7  ;;  %v2345_v40 = vmul.f32 0.70710677, %v2338_v35  ;;  %v499_v56 = vsub.f32 0.0, %v497_v14 }
 0x27b   : > { %v1013_v39 = vmul.f32 %v1011_v36, %v2303_v52  ;;  %v763_v41 = vmul.f32 0.3275911, %v761_v37  ;;  %v789_v62 = vmul.f32 %v761_v37, %v761_v37  ;;  %v503_v16 = vmul.f32 1.442695, %v500_v0 }
 0x27c   : > { %v2348_v42 = vadd.f32 %v1014_v38, %v2306_v55  ;;  %v762_v43 = vand.u32 2147483647, %v2345_v40  ;;  %v501_v8 = vmul.f32 1.442695, %v499_v56  ;;  %vm801_vm3 = vcmp.ge.f32.partialorder %v2334_v31, 0.0 }
 0x27d   : > { %v765_v44 = vadd.f32 1.0, %v763_v41  ;;  %v2352_v15 = vadd.f32 %v1013_v39, %v2306_v55  ;;  %v791_v61 = vsub.f32 0.0, %v789_v62  ;;  %vm802_vm5 = vcmp.ge.f32.partialorder %v2345_v40, 0.0 }
 0x27e   : > { %v1892_v45 = vpop.eup %1891  ;;  %v2355_v46 = vmul.f32 0.70710677, %v2348_v42  ;;  %v764_v49 = vmul.f32 0.3275911, %v762_v43  ;;  %v790_v29 = vmul.f32 %v762_v43, %v762_v43 }
 0x27f   : > { %v1894_v47 = vpop.eup %1893  ;;  %1899 = vrcp.f32 %v765_v44  ;;  %v1272_v50 = vmul.f32 %v1892_v45, %v2272_v25  ;;  %v2360_v53 = vmul.f32 0.70710677, %v2352_v15 }
 0x280   : > { %v1271_v51 = vmul.f32 %v1894_v47, %v2274_v26  ;;  %v2362_v54 = vpop.eup %1895  ;;  %v766_v58 = vadd.f32 1.0, %v764_v49  ;;  %v1022_v59 = vand.u32 2147483647, %v2355_v46  ;;  %v792_v20 = vsub.f32 0.0, %v790_v29 }
 0x281   : > { %v479_v60 = vmul.f32 1.0614054, %v2362_v54  ;;  %v1021_v27 = vand.u32 2147483647, %v2360_v53  ;;  %v1274_v1 = vmul.f32 %v1272_v50, %v2303_v52  ;;  %vm1061_vm6 = vcmp.ge.f32.partialorder %v2360_v53, 0.0 }
 0x282   : > { %v1273_v63 = vmul.f32 %v1271_v51, %v2303_v52  ;;  %1901 = vrcp.f32 %v766_v58  ;;  %v1024_v25 = vmul.f32 0.3275911, %v1022_v59  ;;  %v1050_v7 = vmul.f32 %v1022_v59, %v1022_v59 }
 0x283   : > { %v481_v3 = vadd.f32 -1.4531521, %v479_v60  ;;  %v1023_v57 = vmul.f32 0.3275911, %v1021_v27  ;;  %v2377_v52 = vadd.f32 %v1274_v1, %v2306_v55  ;;  %v795_v39 = vmul.f32 1.442695, %v792_v20 }
 0x284   : > { %v2368_v26 = vpop.eup %1897  ;;  %v1026_v9 = vadd.f32 1.0, %v1024_v25  ;;  %v2374_v18 = vadd.f32 %v1273_v63, %v2306_v55  ;;  %v793_v55 = vmul.f32 1.442695, %v791_v61  ;;  %v1049_v14 = vmul.f32 %v1021_v27, %v1021_v27 }
 0x285   : > { %v480_v6 = vmul.f32 1.0614054, %v2368_v26  ;;  %v483_v10 = vmul.f32 %v2362_v54, %v481_v3  ;;  %v1025_v12 = vadd.f32 1.0, %v1023_v57  ;;  %v2394_v36 = vmul.f32 0.70710677, %v2377_v52 }
 0x286   : > { %1903 = vrcp.f32 %v1026_v9  ;;  %v2386_v24 = vmul.f32 0.70710677, %v2374_v18  ;;  %v1052_v50 = vsub.f32 0.0, %v1050_v7  ;;  %v1051_v63 = vsub.f32 0.0, %v1049_v14 }
 0x287   : > { %v482_v13 = vadd.f32 -1.4531521, %v480_v6  ;;  %v485_v19 = vadd.f32 1.4214138, %v483_v10  ;;  %1905 = vrcp.f32 %v1025_v12  ;;  %v1282_v43 = vand.u32 2147483647, %v2394_v36 }
 0x288   : > { %1907 = vpow2.f32 %v501_v8  ;;  %v1281_v4 = vand.u32 2147483647, %v2386_v24  ;;  %v1055_v10 = vmul.f32 1.442695, %v1052_v50  ;;  %vm1062_vm7 = vcmp.ge.f32.partialorder %v2355_v46, 0.0 }
 0x289   : > { %v2379_v21 = vpop.eup %1899  ;;  %v484_v22 = vmul.f32 %v2368_v26, %v482_v13  ;;  %v487_v30 = vmul.f32 %v2362_v54, %v485_v19  ;;  %1909 = vpow2.f32 %v503_v16  ;;  %v1284_v51 = vmul.f32 0.3275911, %v1282_v43 }
 0x28a   : > { %v771_v32 = vmul.f32 1.0614054, %v2379_v21  ;;  %v1283_v44 = vmul.f32 0.3275911, %v1281_v4  ;;  %1911 = vpow2.f32 %v793_v55  ;;  %vm1321_vm8 = vcmp.ge.f32.partialorder %v2386_v24, 0.0 }
 0x28b   : > { %v486_v34 = vadd.f32 1.4214138, %v484_v22  ;;  %v489_v37 = vadd.f32 -0.28449672, %v487_v30  ;;  %1913 = vpow2.f32 %v795_v39  ;;  %v1286_v0 = vadd.f32 1.0, %v1284_v51 }
 0x28c   : > { %v773_v38 = vadd.f32 -1.4531521, %v771_v32  ;;  %v2397_v41 = vpop.eup %1901  ;;  %v1285_v56 = vadd.f32 1.0, %v1283_v44  ;;  %v1309_v22 = vmul.f32 %v1281_v4, %v1281_v4  ;;  %v1310_v44 = vmul.f32 %v1282_v43, %v1282_v43 }
 0x28d   : > { %v488_v11 = vmul.f32 %v2368_v26, %v486_v34  ;;  %v491_v45 = vmul.f32 %v2362_v54, %v489_v37  ;;  %v772_v47 = vmul.f32 1.0614054, %v2397_v41  ;;  %vm1322_vm9 = vcmp.ge.f32.partialorder %v2394_v36, 0.0 }
 0x28e   : > { %v775_v48 = vmul.f32 %v2379_v21, %v773_v38  ;;  %1915 = vrcp.f32 %v1285_v56 }
 0x28f   : > { %v490_v49 = vadd.f32 -0.28449672, %v488_v11  ;;  %v493_v58 = vadd.f32 0.2548296, %v491_v45  ;;  %v774_v59 = vadd.f32 -1.4531521, %v772_v47  ;;  %1917 = vrcp.f32 %v1286_v0 }
 0x290   : > { %v777_v60 = vadd.f32 1.4214138, %v775_v48  ;;  %v2404_v62 = vpop.eup %1903  ;;  %1919 = vpow2.f32 %v1055_v10  ;;  %v1311_v48 = vsub.f32 0.0, %v1309_v22 }
 0x291   : > { %v492_v27 = vmul.f32 %v2368_v26, %v490_v49  ;;  %v2408_v25 = vpop.eup %1905  ;;  %v495_v1 = vmul.f32 %v2362_v54, %v493_v58  ;;  %v776_v3 = vmul.f32 %v2397_v41, %v774_v59  ;;  %v1032_v57 = vmul.f32 1.0614054, %v2404_v62 }
 0x292   : > { %v779_v29 = vmul.f32 %v2379_v21, %v777_v60  ;;  %v1908_v6 = vpop.eup %1907  ;;  %v1031_v9 = vmul.f32 1.0614054, %v2408_v25  ;;  %v1053_v54 = vmul.f32 1.442695, %v1051_v63 }
 0x293   : > { %v494_v8 = vadd.f32 0.2548296, %v492_v27  ;;  %v505_v61 = vmul.f32 %v1908_v6, %v495_v1  ;;  %v778_v12 = vadd.f32 1.4214138, %v776_v3  ;;  %v1034_v16 = vadd.f32 -1.4531521, %v1032_v57  ;;  %v1910_v30 = vpop.eup %1909 }
 0x294   : > { %v781_v13 = vadd.f32 -0.28449672, %v779_v29  ;;  %v1033_v20 = vadd.f32 -1.4531521, %v1031_v9  ;;  %v1912_v39 = vpop.eup %1911  ;;  %1921 = vpow2.f32 %v1053_v54  ;;  %v1312_v3 = vsub.f32 0.0, %v1310_v44 }
 0x295   : > { %v496_v19 = vmul.f32 %v2368_v26, %v494_v8  ;;  %v507_v32 = vsub.f32 1.0, %v505_v61  ;;  %v780_v55 = vmul.f32 %v2397_v41, %v778_v12  ;;  %v1036_v7 = vmul.f32 %v2404_v62, %v1034_v16  ;;  %v1914_v49 = vpop.eup %1913 }
 0x296   : > { %v783_v34 = vmul.f32 %v2379_v21, %v781_v13  ;;  %v1035_v38 = vmul.f32 %v2408_v25, %v1033_v20  ;;  %v1313_v6 = vmul.f32 1.442695, %v1311_v48 }
 0x297   : > { %v506_v37 = vmul.f32 %v1910_v30, %v496_v19  ;;  %v511_v11 = vsub.f32 0.0, %v507_v32  ;;  %v782_v26 = vadd.f32 -0.28449672, %v780_v55  ;;  %v1038_v47 = vadd.f32 1.4214138, %v1036_v7 }
 0x298   : > { %v785_v14 = vadd.f32 0.2548296, %v783_v34  ;;  %v1037_v45 = vadd.f32 1.4214138, %v1035_v38  ;;  %v2426_v58 = vpop.eup %1915  ;;  %v1315_v34 = vmul.f32 1.442695, %v1312_v3  ;;  %1923 = vpow2.f32 %v1313_v6 }
 0x299   : > { %v508_v4 = vsub.f32 1.0, %v506_v37  ;;  %v513_v50 = vsel %vm509_vm1, %v507_v32, %v511_v11  ;;  %v784_v51 = vmul.f32 %v2397_v41, %v782_v26  ;;  %v1040_v27 = vmul.f32 %v2404_v62, %v1038_v47  ;;  %v2431_v5 = vpop.eup %1917 }
 0x29a   : > { %v787_v56 = vmul.f32 %v2379_v21, %v785_v14  ;;  %v515_v60 = vadd.f32 1.0, %v513_v50  ;;  %v1039_v43 = vmul.f32 %v2408_v25, %v1037_v45  ;;  %v1291_v1 = vmul.f32 1.0614054, %v2426_v58  ;;  %v1920_v30 = vpop.eup %1919 }
 0x29b   : > { %v512_v59 = vsub.f32 0.0, %v508_v4  ;;  %v786_v63 = vadd.f32 0.2548296, %v784_v51  ;;  %v1042_v57 = vadd.f32 -0.28449672, %v1040_v27  ;;  %1925 = vpow2.f32 %v1315_v34 }
 0x29c   : > { %v797_v0 = vmul.f32 %v1912_v39, %v787_v56  ;;  %v1041_v21 = vadd.f32 -0.28449672, %v1039_v43  ;;  %v1292_v61 = vmul.f32 1.0614054, %v2431_v5  ;;  %v517_v12 = vmul.f32 %v515_v60, %v2382_v2 }
 0x29d   : > { %v514_v29 = vsel %vm510_vm2, %v508_v4, %v512_v59  ;;  %v788_v9 = vmul.f32 %v2397_v41, %v786_v63  ;;  %v1044_v16 = vmul.f32 %v2404_v62, %v1042_v57  ;;  %v1293_v19 = vadd.f32 -1.4531521, %v1291_v1  ;;  %v328_v63 = vld [vmem:[%s2290_s29 + $0x8] sm:$0xff] }
 0x29e   : > { %v516_v8 = vadd.f32 1.0, %v514_v29  ;;  %v799_v10 = vsub.f32 1.0, %v797_v0  ;;  %v1043_v13 = vmul.f32 %v2408_v25, %v1041_v21  ;;  %v1294_v22 = vadd.f32 -1.4531521, %v1292_v61  ;;  %v1922_v14 = vpop.eup %1921 }
 0x29f   : > { %v798_v17 = vmul.f32 %v1914_v49, %v788_v9  ;;  %v1046_v55 = vadd.f32 0.2548296, %v1044_v16  ;;  %v1295_v2 = vmul.f32 %v2426_v58, %v1293_v19  ;;  %v1017_v9 = vmul.f32 0.5, %v2352_v15 }
 0x2a0   : > { %v518_v20 = vmul.f32 %v516_v8, %v2389_v28  ;;  %v803_v54 = vsub.f32 0.0, %v799_v10  ;;  %v1045_v32 = vadd.f32 0.2548296, %v1043_v13  ;;  %v1296_v38 = vmul.f32 %v2431_v5, %v1294_v22 }
 0x2a1   : > { %v800_v37 = vsub.f32 1.0, %v798_v17  ;;  %v1048_v11 = vmul.f32 %v2404_v62, %v1046_v55  ;;  %v1297_v26 = vadd.f32 1.4214138, %v1295_v2  ;;  %v757_v62 = vmul.f32 0.5, %v2330_v23  ;;  %v329_v23 = vld [vmem:[%s2290_s29 + $0x10] sm:$0xff] }
 0x2a2   : > { %v1760_v7 = vpack.c.bf16 %v518_v20, %v517_v12  ;;  %v805_v28 = vsel %vm801_vm3, %v799_v10, %v803_v54  ;;  %v1047_v39 = vmul.f32 %v2408_v25, %v1045_v32  ;;  %v1298_v45 = vadd.f32 1.4214138, %v1296_v38  ;;  %v1924_v53 = vpop.eup %1923  ;;  %v522_v38 = vpop.permute.xlu0 %521 }
 0x2a3   : > { %v804_v44 = vsub.f32 0.0, %v800_v37  ;;  %v807_v4 = vadd.f32 1.0, %v805_v28  ;;  %v1058_v47 = vmul.f32 %v1920_v30, %v1048_v11  ;;  %v1299_v48 = vmul.f32 %v2426_v58, %v1297_v26 }
 0x2a4   : > { %1762 = vmatprep.subr.msk.bf16.mxu1 %vm2443_vm4, %v1760_v7  ;;  %v1057_v31 = vmul.f32 %v1922_v14, %v1047_v39  ;;  %v758_v25 = vmul.f32 0.5, %v2338_v35  ;;  %v1300_v50 = vmul.f32 %v2431_v5, %v1298_v45  ;;  %v1018_v35 = vmul.f32 0.5, %v2348_v42  ;;  %v330_v42 = vld [vmem:[%s2290_s29 + $0x18] sm:$0xff] }
 0x2a5   : > { %1765 = vmatpush3.bf16.xpose.msk.msra.mxu1 %vm2443_vm4, %v1760_v7  ;;  %v806_v49 = vsel %vm802_vm5, %v800_v37, %v804_v44  ;;  %v1060_v59 = vsub.f32 1.0, %v1058_v47  ;;  %v1301_v60 = vadd.f32 -0.28449672, %v1299_v48  ;;  %v809_v43 = vmul.f32 %v807_v4, %v757_v62  ;;  %v1926_v15 = vpop.eup %1925 }
 0x2a6   : > { %v808_v51 = vadd.f32 1.0, %v806_v49  ;;  %v1059_v56 = vsub.f32 1.0, %v1057_v31  ;;  %v1302_v27 = vadd.f32 -0.28449672, %v1300_v50  ;;  %v1277_v55 = vmul.f32 0.5, %v2374_v18  ;;  %v527_v18 = vpop.permute.xlu1 %526 }
 0x2a7   : > { %v1064_v3 = vsub.f32 0.0, %v1060_v59  ;;  %v1303_v29 = vmul.f32 %v2426_v58, %v1301_v60  ;;  %v1278_v7 = vmul.f32 0.5, %v2377_v52 }
 0x2a8   : > { %v810_v0 = vmul.f32 %v808_v51, %v758_v25  ;;  %v1063_v1 = vsub.f32 0.0, %v1059_v56  ;;  %v1304_v40 = vmul.f32 %v2431_v5, %v1302_v27 }
 0x2a9   : > { %v1066_v6 = vsel %vm1062_vm7, %v1060_v59, %v1064_v3  ;;  %v1305_v8 = vadd.f32 0.2548296, %v1303_v29 }
 0x2aa   : > { %v1774_v21 = vpack.c.bf16 %v810_v0, %v809_v43  ;;  %v1065_v57 = vsel %vm1061_vm6, %v1059_v56, %v1063_v1  ;;  %v1068_v61 = vadd.f32 1.0, %v1066_v6  ;;  %v1306_v12 = vadd.f32 0.2548296, %v1304_v40  ;;  %v532_v52 = vpop.permute.xlu1 %531 }
 0x2ab   : > { %v1067_v10 = vadd.f32 1.0, %v1065_v57  ;;  %v1307_v46 = vmul.f32 %v2426_v58, %v1305_v8 }
 0x2ac   : > { %1684 = vmatmul.mubr.msk.f32.vlgmr.msra.gmra.mrb[0].mxu1 %vm344_vm0, %v328_v63  ;;  %1776 = vmatprep.subr.msk.bf16.mxu1 %vm2443_vm4, %v1774_v21  ;;  %v1070_v16 = vmul.f32 %v1068_v61, %v1018_v35  ;;  %v1308_v19 = vmul.f32 %v2431_v5, %v1306_v12 }
 0x2ad   : > { %1686 = vmatprep.mubr.msk.f32.mxu1 %vm344_vm0, %v329_v23  ;;  %1779 = vmatpush3.bf16.xpose.msk.msra.mxu1 %vm2443_vm4, %v1774_v21  ;;  %v1069_v13 = vmul.f32 %v1067_v10, %v1017_v9  ;;  %v1317_v20 = vmul.f32 %v1924_v53, %v1307_v46 }
 0x2ae   : > { %v1318_v54 = vmul.f32 %v1926_v15, %v1308_v19  ;;  %v537_v26 = vpop.permute.xlu1 %536 }
 0x2af   : > { %v1788_v17 = vpack.c.bf16 %v1070_v16, %v1069_v13  ;;  %v1319_v22 = vsub.f32 1.0, %v1317_v20 }
 0x2b0   : > { %1687 = vmatmul.mubr.msk.f32.gmra.mrb[2].mxu1 %vm344_vm0, %v330_v42  ;;  %v1320_v58 = vsub.f32 1.0, %v1318_v54 }
 0x2b1   : > { %1704 = vmatprep.mubr.msk.f32.mxu1 %vm344_vm0, %v2293_v33  ;;  %1790 = vmatprep.subr.msk.bf16.mxu1 %vm2443_vm4, %v1788_v17  ;;  %v1323_v30 = vsub.f32 0.0, %v1319_v22 }
 0x2b2   : > { %v1324_v32 = vsub.f32 0.0, %v1320_v58 }
 0x2b3   : > { %v1325_v5 = vsel %vm1321_vm8, %v1319_v22, %v1323_v30 }
 0x2b4   : > { %1705 = vmatmul.mubr.msk.f32.vlgmr.msra.gmra.mrb[4].mxu1 %vm344_vm0, %v328_v63  ;;  %v1326_v2 = vsel %vm1322_vm9, %v1320_v58, %v1324_v32  ;;  %v1327_v34 = vadd.f32 1.0, %v1325_v5 }
 0x2b5   : > { %1793 = vmatpush3.bf16.xpose.msk.msra.mxu1 %vm2443_vm4, %v1788_v17  ;;  %1707 = vmatprep.mubr.msk.f32.mxu1 %vm344_vm0, %v329_v23  ;;  %v1328_v37 = vadd.f32 1.0, %v1326_v2 }
 0x2b6   : > { %v1329_v28 = vmul.f32 %v1327_v34, %v1277_v55 }
 0x2b7   : > { %v1330_v24 = vmul.f32 %v1328_v37, %v1278_v7 }
 0x2b8   : > { %1708 = vmatmul.mubr.msk.f32.gmra.mrb[6].mxu1 %vm344_vm0, %v330_v42 }
 0x2b9   : > { %1725 = vmatprep.mubr.msk.f32.mxu1 %vm344_vm0, %v2293_v33  ;;  %v1802_v36 = vpack.c.bf16 %v1330_v24, %v1329_v28 }
 0x2bb   : > { %1804 = vmatprep.subr.msk.bf16.mxu1 %vm2443_vm4, %v1802_v36 }
 0x2bc   : > { %1726 = vmatmul.mubr.msk.f32.vlgmr.msra.gmra.mrb[8].mxu1 %vm344_vm0, %v328_v63 }
 0x2bd   : > { %1807 = vmatpush3.bf16.xpose.msk.msra.mxu1 %vm2443_vm4, %v1802_v36  ;;  %1728 = vmatprep.mubr.msk.f32.mxu1 %vm344_vm0, %v329_v23 }
 0x2c0   : > { %1729 = vmatmul.mubr.msk.f32.gmra.mrb[10].mxu1 %vm344_vm0, %v330_v42 }
 0x2c1   : > { %1746 = vmatprep.mubr.msk.f32.mxu1 %vm344_vm0, %v2293_v33 }
 0x2c4   : > { %1747 = vmatmul.mubr.msk.f32.vlgmr.msra.gmra.mrb[12].mxu1 %vm344_vm0, %v328_v63 }
 0x2c5   : > { %1749 = vmatprep.mubr.msk.f32.mxu1 %vm344_vm0, %v329_v23 }
 0x2c8   : > { %1750 = vmatmul.mubr.msk.f32.gmra.mrb[14].mxu1 %vm344_vm0, %v330_v42 }
 0x37f   : > { %v1685_v33 = vpop.f32.mrb[0].mxu1 }
 0x380   : > { %v629_v41 = vadd.f32 %v1685_v33, %v527_v18  ;;  %v623_v39 = vpop.f32.mrb[1].mxu1 }
 0x381   : > { %v624_v11 = vadd.f32 %v623_v39, %v522_v38 }
 0x382   : > { %644 = vst.msk [vmem:[%s2513_s12 + $0x8] sm:$0xff] %vm642_vm10, %v629_v41 }
 0x383   : > { %643 = vst.msk [vmem:[%s2513_s12] sm:$0xff] %vm642_vm10, %v624_v11  ;;  %v1688_v14 = vpop.f32.mrb[2].mxu1 }
 0x384   : > { %v639_v44 = vadd.f32 %v1688_v14, %v537_v26  ;;  %v633_v4 = vpop.f32.mrb[3].mxu1 }
 0x385   : > { %v634_v45 = vadd.f32 %v633_v4, %v532_v52 }
 0x386   : > { %646 = vst.msk [vmem:[%s2513_s12 + $0x18] sm:$0xff] %vm642_vm10, %v639_v44 }
 0x387   : > { %645 = vst.msk [vmem:[%s2513_s12 + $0x10] sm:$0xff] %vm642_vm10, %v634_v45  ;;  %v1706_v31 = vpop.f32.mrb[4].mxu1 }
 0x388   : > { %v889_v47 = vadd.f32 %v1706_v31, %v527_v18  ;;  %v883_v48 = vpop.f32.mrb[5].mxu1 }
 0x389   : > { %v884_v62 = vadd.f32 %v883_v48, %v522_v38 }
 0x38a   : > { %1587 = vst.msk [vmem:[%s2513_s12 + $0x28] sm:$0xff] %vm642_vm10, %v889_v47 }
 0x38b   : > { %1586 = vst.msk [vmem:[%s2513_s12 + $0x20] sm:$0xff] %vm642_vm10, %v884_v62  ;;  %v1709_v25 = vpop.f32.mrb[6].mxu1 }
 0x38c   : > { %v899_v49 = vadd.f32 %v1709_v25, %v537_v26  ;;  %v893_v50 = vpop.f32.mrb[7].mxu1 }
 0x38d   : > { %v894_v51 = vadd.f32 %v893_v50, %v532_v52 }
 0x38e   : > { %1589 = vst.msk [vmem:[%s2513_s12 + $0x38] sm:$0xff] %vm642_vm10, %v899_v49 }
 0x38f   : > { %1588 = vst.msk [vmem:[%s2513_s12 + $0x30] sm:$0xff] %vm642_vm10, %v894_v51  ;;  %v1727_v56 = vpop.f32.mrb[8].mxu1 }
 0x390   : > { %v1149_v59 = vadd.f32 %v1727_v56, %v527_v18  ;;  %v1143_v60 = vpop.f32.mrb[9].mxu1 }
 0x391   : > { %v1144_v43 = vadd.f32 %v1143_v60, %v522_v38 }
 0x392   : > { %1599 = vst.msk [vmem:[%s2513_s12 + $0x48] sm:$0xff] %vm642_vm10, %v1149_v59 }
 0x393   : > { %1598 = vst.msk [vmem:[%s2513_s12 + $0x40] sm:$0xff] %vm642_vm10, %v1144_v43  ;;  %v1730_v27 = vpop.f32.mrb[10].mxu1 }
 0x394   : > { %v1159_v63 = vadd.f32 %v1730_v27, %v537_v26  ;;  %v1153_v0 = vpop.f32.mrb[11].mxu1 }
 0x395   : > { %v1154_v1 = vadd.f32 %v1153_v0, %v532_v52 }
 0x396   : > { %1601 = vst.msk [vmem:[%s2513_s12 + $0x58] sm:$0xff] %vm642_vm10, %v1159_v63 }
 0x397   : > { %1600 = vst.msk [vmem:[%s2513_s12 + $0x50] sm:$0xff] %vm642_vm10, %v1154_v1  ;;  %v1748_v3 = vpop.f32.mrb[12].mxu1 }
 0x398   : > { %v1409_v29 = vadd.f32 %v1748_v3, %v527_v18  ;;  %v1403_v23 = vpop.f32.mrb[13].mxu1 }
 0x399   : > { %v1404_v35 = vadd.f32 %v1403_v23, %v522_v38 }
 0x39a   : > { %1611 = vst.msk [vmem:[%s2513_s12 + $0x68] sm:$0xff] %vm642_vm10, %v1409_v29 }
 0x39b   : > { %1610 = vst.msk [vmem:[%s2513_s12 + $0x60] sm:$0xff] %vm642_vm10, %v1404_v35  ;;  %v1751_v40 = vpop.f32.mrb[14].mxu1 }
 0x39c   : > { %v1419_v21 = vadd.f32 %v1751_v40, %v537_v26  ;;  %v1413_v57 = vpop.f32.mrb[15].mxu1 }
 0x39d   : > { %v1414_v6 = vadd.f32 %v1413_v57, %v532_v52 }
 0x39e   : > { %1613 = vst.msk [vmem:[%s2513_s12 + $0x78] sm:$0xff] %vm642_vm10, %v1419_v21 }
 0x39f   : > { %1612 = vst.msk [vmem:[%s2513_s12 + $0x70] sm:$0xff] %vm642_vm10, %v1414_v6 }
 0x3a0 PF: > { %s19_s23 = sadd.s32 1, %s2039_s23   ;;  %s2585_s18 = smov %s2023_s19 }
 0x3a1   : > { %p16_p1 = scmp.ge.s32.totalorder %s19_s23, 4   ;;  %s2586_s19 = smov %s2027_s20 }
 0x3a2   : > { %s2587_s20 = smov %s2162_s9  ;;  %s2588_s21 = smov %s2035_s22 }
 0x3a3   : > { %s2589_s22 = smov %s2591_s6  ;;  %18 = sbr.rel (!%p16_p1) target bundleno = 5 (0x5), region = 96 }
 0x3aa   :  { %1454 = vsyncpa [#allocation3], 1 }
 0x3ab   :  { %1456 = vsyncpa [#allocation3 + $0x1], 1 }
 0x3ac   :  { %1457 = vsyncpa [#allocation5], 1 }

</bundles_post_ra>
